<compile_context>
chip_gen: v5e
topology: v5e:2x2
jax: 0.10.0
libtpu: 0.0.40
codegen_flags: <defaults>
</compile_context>

<pallas_src>
import functools

import jax
import jax.numpy as jnp
from jax import lax
from jax.experimental import pallas as pl
from jax.experimental.pallas import tpu as pltpu


def _round_up(x, m):
    return (x + m - 1) // m * m


def _pam_kernel(n_valid, n_pad,
                x_full_ref, x_tile_ref, wq_ref, wk_ref, wv_ref,
                bq_ref, bk_ref, bv_ref, gamma_ref,
                attn_ref, out_ref, k_sc, v_sc):
    qi = pl.program_id(1)

    # Compute keys / values for the whole batch element once (first query
    # tile); they persist in VMEM scratch across the query-tile grid axis.
    @pl.when(qi == 0)
    def _():
        xb = x_full_ref[0]                                         # (N_pad, C_pad) bf16
        k = jnp.dot(xb, wk_ref[...], preferred_element_type=jnp.float32) + bk_ref[...]
        v = jnp.dot(xb, wv_ref[...], preferred_element_type=jnp.float32) + bv_ref[...]
        k_sc[...] = k.astype(jnp.bfloat16)
        v_sc[...] = v.astype(jnp.bfloat16)

    x_tile = x_tile_ref[0]                                         # (TQ, C_pad) f32
    q = (jnp.dot(x_tile.astype(jnp.bfloat16), wq_ref[...],
                 preferred_element_type=jnp.float32)
         + bq_ref[...]).astype(jnp.bfloat16)                       # (TQ, C8_pad)

    # energy[t, m] = <q[t], k[m]> : contract channel dims directly (no k.T).
    energy = lax.dot_general(
        q, k_sc[...],
        dimension_numbers=(((1,), (1,)), ((), ())),
        preferred_element_type=jnp.float32)                        # (TQ, N_pad) f32

    if n_valid != n_pad:   # static: mask padded key positions out of softmax
        key_idx = lax.broadcasted_iota(jnp.int32, energy.shape, 1)
        energy = jnp.where(key_idx < n_valid, energy, -1e30)

    # Numerically stable softmax over the key dimension (all f32).
    e_max = jnp.max(energy, axis=-1, keepdims=True)
    e_exp = jnp.exp(energy - e_max)
    e_sum = jnp.sum(e_exp, axis=-1, keepdims=True)
    attn = e_exp * pl.reciprocal(e_sum, approx=True)               # (TQ, N_pad) f32
    attn_ref[0] = attn

    # out[t, c] = sum_m attn[t, m] * v[m, c]
    out = jnp.dot(attn.astype(jnp.bfloat16), v_sc[...],
                  preferred_element_type=jnp.float32)              # (TQ, C_pad) f32
    gamma = gamma_ref[0]
    out_ref[0] = gamma * out + x_tile


def pam_forward(x, wq, bq, wk, bk, wv, bv, gamma, *, tq=128):
    """x: (B, C, H, W) float32 (NCHW, like PyTorch).
    wq/wk: (C, C//8), wv: (C, C)  (transpose of Conv2d 1x1 weights), biases 1-D.
    Returns (attention (B, N, N), out (B, C, H, W))."""
    B, C, H, W = x.shape
    N = H * W
    C8 = wq.shape[1]

    n_pad = _round_up(N, 128)
    c_pad = _round_up(C, 128)
    c8_pad = _round_up(C8, 128)
    TQ = min(tq, n_pad)
    assert n_pad % TQ == 0

    f32, bf16 = jnp.float32, jnp.bfloat16

    # NCHW -> (B, N, C); zero-pad to lane-dense multiples of 128.
    xr = jnp.transpose(x.reshape(B, C, N), (0, 2, 1)).astype(f32)
    xr = jnp.pad(xr, ((0, 0), (0, n_pad - N), (0, c_pad - C)))
    x_bf = xr.astype(bf16)   # full-resident bf16 copy for the K/V projections

    def pad2(w, r, c):
        return jnp.pad(w.astype(f32), ((0, r - w.shape[0]), (0, c - w.shape[1])))

    wq_p = pad2(wq, c_pad, c8_pad).astype(bf16)
    wk_p = pad2(wk, c_pad, c8_pad).astype(bf16)
    wv_p = pad2(wv, c_pad, c_pad).astype(bf16)
    bq_p = jnp.pad(bq.astype(f32), (0, c8_pad - C8)).reshape(1, c8_pad)
    bk_p = jnp.pad(bk.astype(f32), (0, c8_pad - C8)).reshape(1, c8_pad)
    bv_p = jnp.pad(bv.astype(f32), (0, c_pad - C)).reshape(1, c_pad)
    gamma_p = gamma.reshape(1).astype(f32)

    kernel = functools.partial(_pam_kernel, N, n_pad)

    flops = 2 * B * n_pad * (2 * c_pad * c8_pad + c_pad * c_pad
                             + n_pad * c8_pad + n_pad * c_pad)
    transcendentals = B * n_pad * n_pad
    bytes_accessed = (B * n_pad * c_pad * (2 + 4 + 4)      # x_bf read, x read, out write
                      + B * n_pad * n_pad * 4              # attention write
                      + 2 * (2 * c_pad * c8_pad + c_pad * c_pad))

    attn, out = pl.pallas_call(
        kernel,
        out_shape=(
            jax.ShapeDtypeStruct((B, n_pad, n_pad), f32),
            jax.ShapeDtypeStruct((B, n_pad, c_pad), f32),
        ),
        grid_spec=pltpu.PrefetchScalarGridSpec(
            num_scalar_prefetch=0,
            grid=(B, n_pad // TQ),
            in_specs=[
                pl.BlockSpec((1, n_pad, c_pad), lambda b, q: (b, 0, 0)),   # x full (bf16)
                pl.BlockSpec((1, TQ, c_pad), lambda b, q: (b, q, 0)),      # x query tile (f32)
                pl.BlockSpec((c_pad, c8_pad), lambda b, q: (0, 0)),        # wq
                pl.BlockSpec((c_pad, c8_pad), lambda b, q: (0, 0)),        # wk
                pl.BlockSpec((c_pad, c_pad), lambda b, q: (0, 0)),         # wv
                pl.BlockSpec((1, c8_pad), lambda b, q: (0, 0)),            # bq
                pl.BlockSpec((1, c8_pad), lambda b, q: (0, 0)),            # bk
                pl.BlockSpec((1, c_pad), lambda b, q: (0, 0)),             # bv
                pl.BlockSpec(memory_space=pltpu.MemorySpace.SMEM),         # gamma scalar
            ],
            out_specs=[
                pl.BlockSpec((1, TQ, n_pad), lambda b, q: (b, q, 0)),      # attention
                pl.BlockSpec((1, TQ, c_pad), lambda b, q: (b, q, 0)),      # out (B, N, C)
            ],
            scratch_shapes=[
                pltpu.VMEM((n_pad, c8_pad), bf16),   # K cache (current batch element)
                pltpu.VMEM((n_pad, c_pad), bf16),    # V cache (current batch element)
            ],
        ),
        compiler_params=pltpu.CompilerParams(
            dimension_semantics=("parallel", "arbitrary"),
            vmem_limit_bytes=48 * 1024 * 1024,
        ),
        cost_estimate=pl.CostEstimate(
            flops=flops, transcendentals=transcendentals,
            bytes_accessed=bytes_accessed),
    )(x_bf, xr, wq_p, wk_p, wv_p, bq_p, bk_p, bv_p, gamma_p)

    attn = attn[:, :N, :N]
    out_nchw = jnp.transpose(out[:, :N, :C], (0, 2, 1)).reshape(B, C, H, W)
    return attn, out_nchw


def _reference(x, wq, bq, wk, bk, wv, bv, gamma):
    """Pure-JAX f32 replica of the PyTorch forward (for a sanity check)."""
    B, C, H, W = x.shape
    N = H * W
    xf = x.reshape(B, C, N)                                        # (B, C, N)
    q = jnp.einsum('oc,bcn->bon', wq.T, xf) + bq[None, :, None]    # (B, C8, N)
    k = jnp.einsum('oc,bcn->bon', wk.T, xf) + bk[None, :, None]
    v = jnp.einsum('oc,bcn->bon', wv.T, xf) + bv[None, :, None]    # (B, C, N)
    energy = jnp.einsum('bcn,bcm->bnm', q, k)                      # (B, N, N)
    attn = jax.nn.softmax(energy, axis=-1)
    out = jnp.einsum('bcm,bnm->bcn', v, attn).reshape(B, C, H, W)
    return attn, gamma[0] * out + x


if __name__ == "__main__":
    key = jax.random.PRNGKey(0)
    B, C, H, W = 2, 16, 8, 8          # in_dim = 16 -> query/key channels = 2
    C8 = C // 8
    N = H * W

    k0, k1, k2, k3, k4, k5, k6 = jax.random.split(key, 7)
    x = jax.random.normal(k0, (B, C, H, W), dtype=jnp.float32)
    # Conv2d(kernel_size=1) weights, stored as (C_in, C_out) matrices.
    wq = jax.random.normal(k1, (C, C8), dtype=jnp.float32) * 0.1
    wk = jax.random.normal(k2, (C, C8), dtype=jnp.float32) * 0.1
    wv = jax.random.normal(k3, (C, C), dtype=jnp.float32) * 0.1
    bq = jax.random.normal(k4, (C8,), dtype=jnp.float32) * 0.1
    bk = jax.random.normal(k5, (C8,), dtype=jnp.float32) * 0.1
    bv = jax.random.normal(k6, (C,), dtype=jnp.float32) * 0.1
    # PyTorch inits gamma to zero; use a nonzero value here so the
    # gamma * out + x epilogue is actually exercised by the test.
    gamma = jnp.full((1,), 0.5, dtype=jnp.float32)

    attn, out = pam_forward(x, wq, bq, wk, bk, wv, bv, gamma)
    jax.block_until_ready((attn, out))

    attn_ref, out_ref = _reference(x, wq, bq, wk, bk, wv, bv, gamma)
    assert attn.shape == (B, N, N)
    assert out.shape == (B, C, H, W)
    # bf16 MXU inputs (f32 accumulation) -> tolerance loosened vs pure-f32 ref.
    assert jnp.allclose(attn, attn_ref, atol=2e-2, rtol=2e-2), \
        float(jnp.max(jnp.abs(attn - attn_ref)))
    assert jnp.allclose(out, out_ref, atol=2e-2, rtol=2e-2), \
        float(jnp.max(jnp.abs(out - out_ref)))

    print("KERNEL_OK")
</pallas_src>

<mosaic_0001>
module attributes {stable_mosaic.version = 11 : i64} {
  func.func @_pam_kernel(%arg0: i32, %arg1: i32, %arg2: memref<1x128x128xbf16, #tpu.memory_space<vmem>>, %arg3: memref<1x128x128xf32, #tpu.memory_space<vmem>>, %arg4: memref<128x128xbf16, #tpu.memory_space<vmem>>, %arg5: memref<128x128xbf16, #tpu.memory_space<vmem>>, %arg6: memref<128x128xbf16, #tpu.memory_space<vmem>>, %arg7: memref<1x128xf32, #tpu.memory_space<vmem>>, %arg8: memref<1x128xf32, #tpu.memory_space<vmem>>, %arg9: memref<1x128xf32, #tpu.memory_space<vmem>>, %arg10: memref<1xf32, #tpu.memory_space<smem>>, %arg11: memref<1x128x128xf32, #tpu.memory_space<vmem>>, %arg12: memref<1x128x128xf32, #tpu.memory_space<vmem>>, %arg13: memref<128x128xbf16, #tpu.memory_space<vmem>>, %arg14: memref<128x128xbf16, #tpu.memory_space<vmem>>) attributes {dimension_semantics = [#tpu.dimension_semantics<parallel>, #tpu.dimension_semantics<arbitrary>], iteration_bounds = array<i64: 2, 1>, scalar_prefetch = 0 : i64, scratch_operands = 2 : i64, tpu.core_type = #tpu.core_type<tc>, window_params = [{transform_indices = @transform_0, window_bounds = array<i64: 1, 128, 128>}, {transform_indices = @transform_1, window_bounds = array<i64: 1, 128, 128>}, {pipeline_mode = #tpu.pipeline_mode<synchronous>, transform_indices = @transform_2, window_bounds = array<i64: 128, 128>}, {pipeline_mode = #tpu.pipeline_mode<synchronous>, transform_indices = @transform_3, window_bounds = array<i64: 128, 128>}, {pipeline_mode = #tpu.pipeline_mode<synchronous>, transform_indices = @transform_4, window_bounds = array<i64: 128, 128>}, {pipeline_mode = #tpu.pipeline_mode<synchronous>, transform_indices = @transform_5, window_bounds = array<i64: 1, 128>}, {pipeline_mode = #tpu.pipeline_mode<synchronous>, transform_indices = @transform_6, window_bounds = array<i64: 1, 128>}, {pipeline_mode = #tpu.pipeline_mode<synchronous>, transform_indices = @transform_7, window_bounds = array<i64: 1, 128>}, {transform_indices = @transform_8, window_bounds = array<i64: 1>}, {transform_indices = @transform_9, window_bounds = array<i64: 1, 128, 128>}, {transform_indices = @transform_10, window_bounds = array<i64: 1, 128, 128>}]} {
    %c0_i32 = arith.constant 0 : i32
    %0 = arith.cmpi eq, %arg1, %c0_i32 : i32
    %1 = arith.extui %0 : i1 to i32
    %c0_i32_0 = arith.constant 0 : i32
    %2 = arith.cmpi ne, %1, %c0_i32_0 : i32
    scf.if %2 {
      %c0_23 = arith.constant 0 : index
      %c0_24 = arith.constant 0 : index
      %c0_25 = arith.constant 0 : index
      %42 = vector.load %arg2[%c0_23, %c0_24, %c0_25] : memref<1x128x128xbf16, #tpu.memory_space<vmem>>, vector<1x128x128xbf16>
      %43 = vector.shape_cast %42 : vector<1x128x128xbf16> to vector<128x128xbf16>
      %c0_26 = arith.constant 0 : index
      %c0_27 = arith.constant 0 : index
      %44 = vector.load %arg5[%c0_26, %c0_27] : memref<128x128xbf16, #tpu.memory_space<vmem>>, vector<128x128xbf16>
      %cst_28 = arith.constant dense<0.000000e+00> : vector<128x128xf32>
      %45 = tpu.matmul %43, %44, %cst_28 {dimension_numbers = #tpu.dot_dimension_numbers<[1], [0], [0], [1], [0, 0, 1, 1], [], []>} : vector<128x128xbf16>, vector<128x128xbf16>, vector<128x128xf32> -> vector<128x128xf32>
      %c0_29 = arith.constant 0 : index
      %c0_30 = arith.constant 0 : index
      %46 = vector.load %arg8[%c0_29, %c0_30] : memref<1x128xf32, #tpu.memory_space<vmem>>, vector<1x128xf32>
      %47 = vector.broadcast %46 : vector<1x128xf32> to vector<128x128xf32>
      %48 = arith.addf %45, %47 : vector<128x128xf32>
      %c0_31 = arith.constant 0 : index
      %c0_32 = arith.constant 0 : index
      %49 = vector.load %arg6[%c0_31, %c0_32] : memref<128x128xbf16, #tpu.memory_space<vmem>>, vector<128x128xbf16>
      %cst_33 = arith.constant dense<0.000000e+00> : vector<128x128xf32>
      %50 = tpu.matmul %43, %49, %cst_33 {dimension_numbers = #tpu.dot_dimension_numbers<[1], [0], [0], [1], [0, 0, 1, 1], [], []>} : vector<128x128xbf16>, vector<128x128xbf16>, vector<128x128xf32> -> vector<128x128xf32>
      %c0_34 = arith.constant 0 : index
      %c0_35 = arith.constant 0 : index
      %51 = vector.load %arg9[%c0_34, %c0_35] : memref<1x128xf32, #tpu.memory_space<vmem>>, vector<1x128xf32>
      %52 = vector.broadcast %51 : vector<1x128xf32> to vector<128x128xf32>
      %53 = arith.addf %50, %52 : vector<128x128xf32>
      %54 = arith.truncf %48 : vector<128x128xf32> to vector<128x128xbf16>
      %c0_36 = arith.constant 0 : index
      %c0_37 = arith.constant 0 : index
      %55 = vector.load %arg13[%c0_36, %c0_37] : memref<128x128xbf16, #tpu.memory_space<vmem>>, vector<128x128xbf16>
      tpu.vector_store %arg13[%c0_36, %c0_37], %54 {strides = array<i32>} : memref<128x128xbf16, #tpu.memory_space<vmem>>, vector<128x128xbf16>,
      %56 = arith.truncf %53 : vector<128x128xf32> to vector<128x128xbf16>
      %c0_38 = arith.constant 0 : index
      %c0_39 = arith.constant 0 : index
      %57 = vector.load %arg14[%c0_38, %c0_39] : memref<128x128xbf16, #tpu.memory_space<vmem>>, vector<128x128xbf16>
      tpu.vector_store %arg14[%c0_38, %c0_39], %56 {strides = array<i32>} : memref<128x128xbf16, #tpu.memory_space<vmem>>, vector<128x128xbf16>,
    } else {
    }
    %c0 = arith.constant 0 : index
    %c0_1 = arith.constant 0 : index
    %c0_2 = arith.constant 0 : index
    %3 = vector.load %arg3[%c0, %c0_1, %c0_2] : memref<1x128x128xf32, #tpu.memory_space<vmem>>, vector<1x128x128xf32>
    %4 = vector.shape_cast %3 : vector<1x128x128xf32> to vector<128x128xf32>
    %5 = arith.truncf %4 : vector<128x128xf32> to vector<128x128xbf16>
    %c0_3 = arith.constant 0 : index
    %c0_4 = arith.constant 0 : index
    %6 = vector.load %arg4[%c0_3, %c0_4] : memref<128x128xbf16, #tpu.memory_space<vmem>>, vector<128x128xbf16>
    %cst = arith.constant dense<0.000000e+00> : vector<128x128xf32>
    %7 = tpu.matmul %5, %6, %cst {dimension_numbers = #tpu.dot_dimension_numbers<[1], [0], [0], [1], [0, 0, 1, 1], [], []>} : vector<128x128xbf16>, vector<128x128xbf16>, vector<128x128xf32> -> vector<128x128xf32>
    %c0_5 = arith.constant 0 : index
    %c0_6 = arith.constant 0 : index
    %8 = vector.load %arg7[%c0_5, %c0_6] : memref<1x128xf32, #tpu.memory_space<vmem>>, vector<1x128xf32>
    %9 = vector.broadcast %8 : vector<1x128xf32> to vector<128x128xf32>
    %10 = arith.addf %7, %9 : vector<128x128xf32>
    %11 = arith.truncf %10 : vector<128x128xf32> to vector<128x128xbf16>
    %c0_7 = arith.constant 0 : index
    %c0_8 = arith.constant 0 : index
    %12 = vector.load %arg13[%c0_7, %c0_8] : memref<128x128xbf16, #tpu.memory_space<vmem>>, vector<128x128xbf16>
    %cst_9 = arith.constant dense<0.000000e+00> : vector<128x128xf32>
    %13 = tpu.matmul %11, %12, %cst_9 {dimension_numbers = #tpu.dot_dimension_numbers<[1], [1], [0], [0], [0, 0, 1, 0], [], []>} : vector<128x128xbf16>, vector<128x128xbf16>, vector<128x128xf32> -> vector<128x128xf32>
    %14 = tpu.iota {dimensions = array<i32: 1>} : vector<128x128xi32>
    %c64_i32 = arith.constant 64 : i32
    %15 = vector.broadcast %c64_i32 : i32 to vector<128x128xi32>
    %16 = arith.cmpi slt, %14, %15 : vector<128x128xi32>
    %cst_10 = arith.constant -1.000000e+30 : f32
    %17 = vector.broadcast %cst_10 : f32 to vector<128x128xf32>
    %18 = arith.select %16, %13, %17 : vector<128x128xi1>, vector<128x128xf32>
    %cst_11 = arith.constant dense<0xFF800000> : vector<128xf32>
    %19 = vector.multi_reduction <maximumf>, %18, %cst_11 [1] : vector<128x128xf32> to vector<128xf32>
    %20 = vector.shape_cast %19 : vector<128xf32> to vector<128x1xf32>
    %21 = vector.broadcast %20 : vector<128x1xf32> to vector<128x128xf32>
    %22 = arith.subf %18, %21 : vector<128x128xf32>
    %23 = math.exp %22 : vector<128x128xf32>
    %cst_12 = arith.constant dense<0.000000e+00> : vector<128xf32>
    %24 = vector.multi_reduction <add>, %23, %cst_12 [1] : vector<128x128xf32> to vector<128xf32>
    %25 = vector.shape_cast %24 : vector<128xf32> to vector<128x1xf32>
    %26 = tpu.reciprocal %25 {approx = true} : vector<128x1xf32> -> vector<128x1xf32>
    %27 = vector.broadcast %26 : vector<128x1xf32> to vector<128x128xf32>
    %28 = arith.mulf %23, %27 : vector<128x128xf32>
    %c0_13 = arith.constant 0 : index
    %c0_14 = arith.constant 0 : index
    %c0_15 = arith.constant 0 : index
    %29 = vector.load %arg11[%c0_13, %c0_14, %c0_15] : memref<1x128x128xf32, #tpu.memory_space<vmem>>, vector<1x128x128xf32>
    %30 = vector.shape_cast %29 : vector<1x128x128xf32> to vector<128x128xf32>
    %31 = vector.shape_cast %28 : vector<128x128xf32> to vector<1x128x128xf32>
    tpu.vector_store %arg11[%c0_13, %c0_14, %c0_15], %31 {strides = array<i32>} : memref<1x128x128xf32, #tpu.memory_space<vmem>>, vector<1x128x128xf32>,
    %32 = arith.truncf %28 : vector<128x128xf32> to vector<128x128xbf16>
    %c0_16 = arith.constant 0 : index
    %c0_17 = arith.constant 0 : index
    %33 = vector.load %arg14[%c0_16, %c0_17] : memref<128x128xbf16, #tpu.memory_space<vmem>>, vector<128x128xbf16>
    %cst_18 = arith.constant dense<0.000000e+00> : vector<128x128xf32>
    %34 = tpu.matmul %32, %33, %cst_18 {dimension_numbers = #tpu.dot_dimension_numbers<[1], [0], [0], [1], [0, 0, 1, 1], [], []>} : vector<128x128xbf16>, vector<128x128xbf16>, vector<128x128xf32> -> vector<128x128xf32>
    %c0_19 = arith.constant 0 : index
    %35 = memref.load %arg10[%c0_19] : memref<1xf32, #tpu.memory_space<smem>>
    %36 = vector.broadcast %35 : f32 to vector<128x128xf32>
    %37 = arith.mulf %36, %34 : vector<128x128xf32>
    %38 = arith.addf %37, %4 : vector<128x128xf32>
    %c0_20 = arith.constant 0 : index
    %c0_21 = arith.constant 0 : index
    %c0_22 = arith.constant 0 : index
    %39 = vector.load %arg12[%c0_20, %c0_21, %c0_22] : memref<1x128x128xf32, #tpu.memory_space<vmem>>, vector<1x128x128xf32>
    %40 = vector.shape_cast %39 : vector<1x128x128xf32> to vector<128x128xf32>
    %41 = vector.shape_cast %38 : vector<128x128xf32> to vector<1x128x128xf32>
    tpu.vector_store %arg12[%c0_20, %c0_21, %c0_22], %41 {strides = array<i32>} : memref<1x128x128xf32, #tpu.memory_space<vmem>>, vector<1x128x128xf32>,
    return
  }
  func.func @transform_0(%arg0: i32, %arg1: i32) -> (i32, i32, i32) {
    %c0_i32 = arith.constant 0 : i32
    %c0_i32_0 = arith.constant 0 : i32
    %c0_i32_1 = arith.constant 0 : i32
    return %arg0, %c0_i32, %c0_i32_0 : i32, i32, i32
  }
  func.func @transform_1(%arg0: i32, %arg1: i32) -> (i32, i32, i32) {
    %c0_i32 = arith.constant 0 : i32
    %c0_i32_0 = arith.constant 0 : i32
    return %arg0, %arg1, %c0_i32 : i32, i32, i32
  }
  func.func @transform_2(%arg0: i32, %arg1: i32) -> (i32, i32) {
    %c0_i32 = arith.constant 0 : i32
    %c0_i32_0 = arith.constant 0 : i32
    %c0_i32_1 = arith.constant 0 : i32
    return %c0_i32, %c0_i32_0 : i32, i32
  }
  func.func @transform_3(%arg0: i32, %arg1: i32) -> (i32, i32) {
    %c0_i32 = arith.constant 0 : i32
    %c0_i32_0 = arith.constant 0 : i32
    %c0_i32_1 = arith.constant 0 : i32
    return %c0_i32, %c0_i32_0 : i32, i32
  }
  func.func @transform_4(%arg0: i32, %arg1: i32) -> (i32, i32) {
    %c0_i32 = arith.constant 0 : i32
    %c0_i32_0 = arith.constant 0 : i32
    %c0_i32_1 = arith.constant 0 : i32
    return %c0_i32, %c0_i32_0 : i32, i32
  }
  func.func @transform_5(%arg0: i32, %arg1: i32) -> (i32, i32) {
    %c0_i32 = arith.constant 0 : i32
    %c0_i32_0 = arith.constant 0 : i32
    %c0_i32_1 = arith.constant 0 : i32
    return %c0_i32, %c0_i32_0 : i32, i32
  }
  func.func @transform_6(%arg0: i32, %arg1: i32) -> (i32, i32) {
    %c0_i32 = arith.constant 0 : i32
    %c0_i32_0 = arith.constant 0 : i32
    %c0_i32_1 = arith.constant 0 : i32
    return %c0_i32, %c0_i32_0 : i32, i32
  }
  func.func @transform_7(%arg0: i32, %arg1: i32) -> (i32, i32) {
    %c0_i32 = arith.constant 0 : i32
    %c0_i32_0 = arith.constant 0 : i32
    %c0_i32_1 = arith.constant 0 : i32
    return %c0_i32, %c0_i32_0 : i32, i32
  }
  func.func @transform_8(%arg0: i32, %arg1: i32) -> i32 {
    %c0_i32 = arith.constant 0 : i32
    %c0_i32_0 = arith.constant 0 : i32
    return %c0_i32 : i32
  }
  func.func @transform_9(%arg0: i32, %arg1: i32) -> (i32, i32, i32) {
    %c0_i32 = arith.constant 0 : i32
    %c0_i32_0 = arith.constant 0 : i32
    return %arg0, %arg1, %c0_i32 : i32, i32, i32
  }
  func.func @transform_10(%arg0: i32, %arg1: i32) -> (i32, i32, i32) {
    %c0_i32 = arith.constant 0 : i32
    %c0_i32_0 = arith.constant 0 : i32
    return %arg0, %arg1, %c0_i32 : i32, i32, i32
  }
}

</mosaic_0001>

<bundles_post_ra>
// kernel: tpu_custom_call.1
= control target key start
LH: loop header
LB: loop body
LE: loop exit
PB: predicated region body
PF: predicated region fallthrough
CT: control target
= control target key end

     0   :  { %s3217_s0 = inlined_call_operand.hbm [shape: bf16[2,128,128], index: 0, kind: input, shape index: {}]   ;;  %s3218_s1 = inlined_call_operand.hbm [shape: f32[2,128,128], index: 1, kind: input, shape index: {}]   ;;  %s3219_s2 = inlined_call_operand.hbm [shape: bf16[128,128], index: 2, kind: input, shape index: {}]   ;;  %s3220_s3 = inlined_call_operand.hbm [shape: bf16[128,128], index: 3, kind: input, shape index: {}]   ;;  %s3221_s4 = inlined_call_operand.hbm [shape: bf16[128,128], index: 4, kind: input, shape index: {}]   ;;  %s3222_s5 = inlined_call_operand.vmem [shape: f32[1,128], index: 5, kind: input, shape index: {}]   ;;  %s3223_s6 = inlined_call_operand.vmem [shape: f32[1,128], index: 6, kind: input, shape index: {}]   ;;  %s3224_s7 = inlined_call_operand.vmem [shape: f32[1,128], index: 7, kind: input, shape index: {}]   ;;  %s3225_s8 = inlined_call_operand.<no memory space> [shape: f32[1], index: 8, kind: input, shape index: {}]   ;;  %s3226_s9 = inlined_call_operand.hbm [shape: f32[2,128,128], index: 9, kind: output, shape index: {0}]   ;;  %s3227_s10 = inlined_call_operand.hbm [shape: f32[2,128,128], index: 10, kind: output, shape index: {1}]  }
   0x1   :  { %3237 = sst [smem:[#allocation29_spill]] %s3217_s0 }
   0x2   :  { %3238 = sst [smem:[#allocation30_spill]] %s3219_s2 }
   0x3   :  { %3239 = sst [smem:[#allocation31_spill]] %s3220_s3 }
   0x4   :  { %3240 = sst [smem:[#allocation32_spill]] %s3221_s4 }
   0x5   :  { %3241 = sst [smem:[#allocation33_spill]] %s3227_s10 }
   0x6   :  { %16 = sst [smem:[#allocation4]] %s3225_s8 }
   0x7   :  { %17 = vsyncpa [#allocation6], 0 }
   0x8   :  { %19 = vsyncpa [#allocation6 + $0x1], 0 }
   0x9   :  { %20 = vsyncpa [#allocation9], 0 }
   0xa   :  { %22 = vsyncpa [#allocation9 + $0x1], 0 }
   0xb   :  { %23 = vsyncpa [#allocation12], 0 }
   0xc   :  { %24 = vsyncpa [#allocation7], 0 }
   0xd   :  { %26 = vsyncpa [#allocation7 + $0x1], 0 }
   0xe   :  { %27 = vsyncpa [#allocation16], 0 }
   0xf   :  { %29 = vsyncpa [#allocation16 + $0x1], 0  ;;  %s2604_s15 = smov 0   ;;  %s2606_s16 = smov 0  }
  0x10   :  { %s2608_s17 = smov 0   ;;  %s2610_s18 = smov 0  }
  0x11   :  { %s2612_s19 = smov 0   ;;  %s2614_s8 = smov 0  }
  0x12 LB: > { %3242 = sst [smem:[#allocation23_spill]] %s2515_s15  ;;  %s2635_s20 = sadd.s32 4294967295, %s2535_s8   ;;  %s2535_s8 = sphi %s2614_s8, %s35_s8   ;;  %s2531_s19 = sphi %s2612_s19, %s3271_s19   ;;  %s2527_s18 = sphi %s2610_s18, %s3270_s18   ;;  %s2523_s17 = sphi %s2608_s17, %s3266_s17   ;;  %s2519_s16 = sphi %s2606_s16, %s3269_s16   ;;  %s2515_s15 = sphi %s2604_s15, %s3268_s15  }
  0x13   : > { %3243 = sst [smem:[#allocation24_spill]] %s2523_s17  ;;  %s1701_s21 = sadd.s32 4294967294, %s2535_s8  }
  0x14   : > { %3244 = sst [smem:[#allocation25_spill]] %s2535_s8  ;;  %p67_p0 = scmp.ne.s32.totalorder %s2519_s16, %s2515_s15 }
  0x15   : > { %p68_p1 = scmp.eq.s32.totalorder %s2635_s20, 0  ;;  %p268_p2 = scmp.eq.s32.totalorder %s2635_s20, 1 }
  0x16   : > { %p274_p3 = scmp.eq.s32.totalorder %s1701_s21, 1  ;;  %p1702_p5 = scmp.ge.s32.totalorder %s2535_s8, 1 }
  0x17   : > { %p2644_p4 = por %p68_p1, %p67_p0  ;;  %p309_p7 = scmp.lt.s32.totalorder %s2535_s8, 3 }
  0x18   : > { %p2649_p6 = por %p274_p3, %p67_p0  ;;  %s3248_s2 = sld [smem:[#allocation30_spill]] }
  0x19   : > { %p2657_p8 = pnand %p1702_p5, %p309_p7  ;;  %s2537_s28 = smov [#allocation10]  }
  0x1a   : > { %s3246_s23 = scalar_select %p2649_p6, 1, 0 }
  0x1b   : > { %p2103_p9 = pneg %p2657_p8  ;;  %s322_s29 = sshll.u32 %s2537_s28, 4  ;;  %s323_s29 = int_to_ptr.vmem [resolvable:$true] %s322_s29 }
  0x1c   : > { %3247 = sst [smem:[#allocation26_spill]] %s3246_s23  ;;  %p1706_p11 = scmp.ge.s32.totalorder %s2535_s8, 2 }
  0x1d   : > { %p2665_p10 = pnand %p2103_p9, %p68_p1  ;;  %s3251_s3 = sld [smem:[#allocation31_spill]] }
  0x1e   : > { %s320_s26 = sshll.u32 %s3248_s2, 4  ;;  %s3228_s14 = smov 64   ;;  %s321_s26 = int_to_ptr.hbm [resolvable:$true] %s320_s26 }
  0x1f   : > { %s3229_s21 = smov 4   ;;  %s2540_s24 = smov [#allocation11]  }
  0x20   : > { %2106 = dma.hbm_to_vmem [thread:$0]  (!%p2665_p10), %s321_s26, 1024, %s323_s29, [#allocation9], %s3228_s14, %s3228_s14, %s3229_s21  }
  0x21   : > { %s336_s25 = sshll.u32 %s2540_s24, 4  ;;  %s3252_s4 = sld [smem:[#allocation32_spill]]  ;;  %s337_s25 = int_to_ptr.vmem [resolvable:$true] %s336_s25 }
  0x22   : > { %s2541_s12 = smov [#allocation13]   ;;  %s47_s2 = sadd.s32 1, %s2531_s19 }
  0x23   : > { %s334_s13 = sshll.u32 %s3251_s3, 4  ;;  %s350_s3 = sshll.u32 %s2541_s12, 4  ;;  %s335_s13 = int_to_ptr.hbm [resolvable:$true] %s334_s13  ;;  %s351_s3 = int_to_ptr.vmem [resolvable:$true] %s350_s3 }
  0x24   : > { %2109 = dma.hbm_to_vmem [thread:$0]  (!%p2665_p10), %s335_s13, 1024, %s337_s25, [#allocation12], %s3228_s14, %s3228_s14, %s3229_s21  }
  0x25   : > { %p49_p12 = scmp.ge.s32.totalorder %s47_s2, 2  ;;  %s54_s26 = sadd.s32 1, %s2523_s17 }
  0x26   : > { %p61_p13 = scmp.ne.s32.totalorder %s2523_s17, %s2519_s16  ;;  %p62_p0 = scmp.eq.s32.totalorder %s2535_s8, 0 }
  0x27   : > { %s348_s11 = sshll.u32 %s3252_s4, 4  ;;  %s3273_s2 = smov (%p49_p12, %s47_s2), 0  ;;  %s349_s11 = int_to_ptr.hbm [resolvable:$true] %s348_s11 }
  0x28   : > { %2112 = dma.hbm_to_vmem [thread:$0]  (!%p2665_p10), %s349_s11, 1024, %s351_s3, [#allocation12], %s3228_s14, %s3228_s14, %s3229_s21  }
  0x29   : > { %3253 = sst [smem:[#allocation27_spill]] %s3273_s2  ;;  %p2698_p3 = por %p62_p0, %p61_p13 }
  0x2a   : > { %p2704_p5 = por %p268_p2, %p61_p13  ;;  %s51_s3 = ssub.s32 %s2531_s19, %s3273_s2 }
  0x2b   : > { %p2130_p7 = scmp.lt.s32.totalorder %s2535_s8, 2  ;;  %p52_p9 = scmp.eq.s32.totalorder %s51_s3, 0 }
  0x2c   : > { %s376_s13 = sand.u32 1, %s2523_s17   ;;  %s1921_s28 = sshll.u32 %s2531_s19, 6 }
  0x2d   : > { %s1707_s24 = sshll.u32 %s376_s13, 6  ;;  %s3257_s0 = sld [smem:[#allocation29_spill]] }
  0x2e   : > { %s2713_s25 = scalar_select %p52_p9, %s2523_s17, %s54_s26  }
  0x2f   : > { %s380_s21 = scalar_lea.vmem [#allocation5], %s1707_s24  ;;  %p2721_p2 = pnand %p2130_p7, %p2698_p3 }
  0x30   : > { %3256 = sst [smem:[#allocation28_spill]] %s2713_s25  ;;  %s388_s4 = sshll.u32 %s380_s21, 4  ;;  %s389_s4 = int_to_ptr.vmem [resolvable:$true] %s388_s4 }
  0x31   : > { %s398_s3 = sand.u32 1, %s2535_s8   ;;  %s1710_s26 = sshll.u32 %s376_s13, 7 }
  0x32   : > { %s377_s25 = scalar_lea.sflag [#allocation6], %s376_s13  ;;  %s3259_s17 = smov 4  }
  0x33   : > { %s385_s14 = scalar_lea.hbm %s3257_s0, %s1921_s28  ;;  %s3260_s15 = smov 64  }
  0x34   : > { %s386_s23 = sshll.u32 %s385_s14, 4  ;;  %s1922_s24 = sshll.u32 %s2531_s19, 7  ;;  %s387_s23 = int_to_ptr.hbm [resolvable:$true] %s386_s23 }
  0x35   : > { %2116 = dma.hbm_to_vmem [thread:$0]  (!%p2721_p2), %s387_s23, 1024, %s389_s4, %s377_s25, %s3260_s15, %s3260_s15, %s3259_s17  }
  0x36   : > { %s409_s28 = scalar_lea.hbm %s3218_s1, %s1922_s24  ;;  %s402_s29 = scalar_lea.vmem [#allocation8], %s1710_s26 }
  0x37   : > { %s412_s11 = sshll.u32 %s402_s29, 4  ;;  %s410_s12 = sshll.u32 %s409_s28, 4  ;;  %s413_s11 = int_to_ptr.vmem [resolvable:$true] %s412_s11  ;;  %s411_s12 = int_to_ptr.hbm [resolvable:$true] %s410_s12 }
  0x38   : > { %s399_s0 = scalar_lea.sflag [#allocation9], %s398_s3  ;;  %s2542_s10 = smov 128  }
  0x39   : > { %s2543_s8 = smov 8   ;;  %424 = sbr.rel (%p2657_p8) target bundleno = 1060 (0x424), region = 56 }
  0x3a   : > { %2119 = dma.hbm_to_vmem [thread:$0]  (!%p2721_p2), %s411_s12, 2048, %s413_s11, %s399_s0, %s2542_s10, %s2542_s10, %s2543_s8  }
  0x3b   : > { %s2740_s4 = sand.u32 (!%p2657_p8), 1, %s2519_s16  }
  0x3c   : > { %s1714_s15 = sshll.u32 (!%p2657_p8), %s2740_s4, 6  ;;  %s427_s17 = scalar_lea.sflag (!%p2657_p8), [#allocation6], %s2740_s4 }
  0x3d   : > { %s2744_s23 = scalar_lea.vmem (!%p2657_p8), [#allocation5], %s1714_s15 }
  0x3e   : > { %2490 = dma.done.wait (%p2644_p4), %s427_s17, 1024  }
  0x3f   : > { %2492 = vsyncadd (%p2644_p4), %s427_s17, 4294966272  ;;  %s436_s0 = sand.u32 1, %s2635_s20   ;;  %s2752_s10 = sshll.u32 %s2740_s4, 7 }
  0x40   : > { %s437_s8 = scalar_lea.sflag [#allocation9], %s436_s0  ;;  %s2755_s27 = scalar_lea.vmem [#allocation8], %s2752_s10 }
  0x41   : > { %2494 = dma.done.wait (%p2644_p4), %s437_s8, 2048  }
  0x42   : > { %2496 = vsyncadd (%p2644_p4), %s437_s8, 4294965248 }
  0x43   : > { %2498 = dma.done.wait (%p68_p1), [#allocation9], 1024  }
  0x44   : > { %2500 = vsyncadd (%p68_p1), [#allocation9], 4294966272 }
  0x45   : > { %2502 = dma.done.wait (%p68_p1), [#allocation12], 2048  }
  0x46   : > { %2504 = vsyncadd (%p68_p1), [#allocation12], 4294965248  ;;  %v1938_v0 = vld [vmem:[#allocation11 + $0x38] sm:$0xff]  ;;  %v1937_v1 = vld [vmem:[#allocation11 + $0x30] sm:$0xff]  ;;  %s3040_s26 = scalar_lea.vmem [#allocation14], %s2752_s10  ;;  %s1434_s24 = sld [smem:[#allocation4]] }
  0x47   : > { %2068 = vmatpush.bf16.msra.mxu2 %v1938_v0  ;;  %642 = vmatpush.bf16.msra.mxu0 %v1938_v0  ;;  %v1936_v2 = vld [vmem:[#allocation11 + $0x28] sm:$0xff]  ;;  %v1935_v3 = vld [vmem:[#allocation11 + $0x20] sm:$0xff]  ;;  %v1934_v4 = vld [vmem:[#allocation11 + $0x18] sm:$0xff]  ;;  %s3093_s21 = scalar_lea.vmem [#allocation15], %s2752_s10  ;;  %s1971_s14 = sshll.u32 %s2527_s18, 7 }
  0x48   : > { %2067 = vmatpush.bf16.msra.mxu1 %v1938_v0  ;;  %v1933_v5 = vld [vmem:[#allocation11 + $0x10] sm:$0xff]  ;;  %v1932_v6 = vld [vmem:[#allocation11 + $0x8] sm:$0xff]  ;;  %v1931_v7 = vld [vmem:[#allocation11] sm:$0xff]  ;;  %s1503_s11 = scalar_lea.hbm %s3226_s9, %s1971_s14  ;;  %s1504_s12 = sshll.u32 %s3040_s26, 4  ;;  %s1505_s12 = int_to_ptr.vmem [resolvable:$true] %s1504_s12 }
  0x49   : > { %v2770_v8 = vld [vmem:[%s2744_s23 + $0x28] sm:$0xff]  ;;  %v2774_v9 = vld [vmem:[%s2744_s23] sm:$0xff]  ;;  %v2777_v10 = vld [vmem:[%s2744_s23 + $0x18] sm:$0xff]  ;;  %s1506_s15 = sshll.u32 %s1503_s11, 4  ;;  %s1485_s17 = scalar_lea.sflag [#allocation7], %s2740_s4  ;;  %s1507_s15 = int_to_ptr.hbm [resolvable:$true] %s1506_s15 }
  0x4a   : > { %v1954_v11 = vld [vmem:[#allocation10 + $0x38] sm:$0xff]  ;;  %v1953_v12 = vld [vmem:[#allocation10 + $0x30] sm:$0xff]  ;;  %v1952_v13 = vld [vmem:[#allocation10 + $0x28] sm:$0xff] }
  0x4b   : > { %2070 = vmatpush.bf16.msra.mxu2 %v1937_v1  ;;  %643 = vmatpush.bf16.msra.mxu0 %v1937_v1  ;;  %v1951_v14 = vld [vmem:[#allocation10 + $0x20] sm:$0xff]  ;;  %v2782_v15 = vld [vmem:[%s2744_s23 + $0x30] sm:$0xff]  ;;  %v2785_v16 = vld [vmem:[%s2744_s23 + $0x8] sm:$0xff] }
  0x4c   : > { %2069 = vmatpush.bf16.msra.mxu1 %v1937_v1  ;;  %v2788_v17 = vld [vmem:[%s2744_s23 + $0x20] sm:$0xff]  ;;  %v1950_v18 = vld [vmem:[#allocation10 + $0x18] sm:$0xff]  ;;  %v1949_v19 = vld [vmem:[#allocation10 + $0x10] sm:$0xff] }
  0x4d   : > { %v1948_v20 = vld [vmem:[#allocation10 + $0x8] sm:$0xff]  ;;  %v1947_v21 = vld [vmem:[#allocation10] sm:$0xff]  ;;  %v2794_v22 = vld [vmem:[%s2744_s23 + $0x38] sm:$0xff] }
  0x4e   : > { %v2797_v23 = vld [vmem:[%s2744_s23 + $0x10] sm:$0xff]  ;;  %v2802_v24 = vld [vmem:[%s2755_s27] sm:$0xff]  ;;  %v2805_v25 = vld [vmem:[%s2755_s27 + $0x8] sm:$0xff]  ;;  %s2423_s23 = sshra.s32 %s1507_s15, 4  ;;  %s2424_s23 = int_to_ptr.hbm [resolvable:$true] %s2423_s23 }
  0x4f   : > { %2072 = vmatpush.bf16.msra.mxu2 %v1936_v2  ;;  %644 = vmatpush.bf16.msra.mxu0 %v1936_v2  ;;  %v888_v26 = vpack.c.bf16 %v2805_v25, %v2802_v24  ;;  %v2810_v27 = vld [vmem:[%s2755_s27 + $0x10] sm:$0xff]  ;;  %v2813_v28 = vld [vmem:[%s2755_s27 + $0x18] sm:$0xff]  ;;  %v2818_v30 = vld [vmem:[%s2755_s27 + $0x20] sm:$0xff]  ;;  %s2425_s0 = scalar_lea.hbm %s2424_s23, 128  ;;  %p2430_p10 = scmp.lt.s32.totalorder %s2424_s23, %s3226_s9 }
  0x50   : > { %2071 = vmatpush.bf16.msra.mxu1 %v1936_v2  ;;  %v889_v29 = vpack.c.bf16 %v2813_v28, %v2810_v27  ;;  %v2821_v31 = vld [vmem:[%s2755_s27 + $0x28] sm:$0xff]  ;;  %v2826_v33 = vld [vmem:[%s2755_s27 + $0x30] sm:$0xff]  ;;  %v2829_v34 = vld [vmem:[%s2755_s27 + $0x38] sm:$0xff]  ;;  %p2426_p1 = scmp.ne.s32.totalorder %s2424_s23, %s2425_s0 }
  0x51   : > { %v890_v32 = vpack.c.bf16 %v2821_v31, %v2818_v30  ;;  %v891_v35 = vpack.c.bf16 %v2829_v34, %v2826_v33  ;;  %v2834_v39 = vld [vmem:[%s2755_s27 + $0x40] sm:$0xff]  ;;  %v2837_v40 = vld [vmem:[%s2755_s27 + $0x48] sm:$0xff] }
  0x52   : > { %v2192_v41 = vld [vmem:[%s3223_s6] ss:$0 sm:$0xff]  ;;  %v892_v42 = vpack.c.bf16 %v2837_v40, %v2834_v39  ;;  %p2427_p4 = pnand %p2426_p1, %p2704_p5 }
  0x53   : > { %2074 = vmatpush.bf16.msra.mxu2 %v1935_v3  ;;  %645 = vmatpush.bf16.msra.mxu0 %v1935_v3 }
  0x54   : > { %2073 = vmatpush.bf16.msra.mxu1 %v1935_v3  ;;  %p2428_p8 = pneg %p2427_p4 }
  0x57   : > { %2076 = vmatpush.bf16.msra.mxu2 %v1934_v4  ;;  %646 = vmatpush.bf16.msra.mxu0 %v1934_v4 }
  0x58   : > { %2075 = vmatpush.bf16.msra.mxu1 %v1934_v4 }
  0x5b   : > { %2078 = vmatpush.bf16.msra.mxu2 %v1933_v5  ;;  %647 = vmatpush.bf16.msra.mxu0 %v1933_v5 }
  0x5c   : > { %2077 = vmatpush.bf16.msra.mxu1 %v1933_v5 }
  0x5f   : > { %2080 = vmatpush.bf16.msra.mxu2 %v1932_v6  ;;  %648 = vmatpush.bf16.msra.mxu0 %v1932_v6 }
  0x60   : > { %2079 = vmatpush.bf16.msra.mxu1 %v1932_v6 }
  0x63   : > { %2082 = vmatpush.bf16.msra.mxu2 %v1931_v7  ;;  %649 = vmatpush.bf16.msra.mxu0 %v1931_v7 }
  0x64   : > { %2081 = vmatpush.bf16.msra.mxu1 %v1931_v7 }
  0x66   : > { %675 = vmatmul.bf16.vlgmr.msra.gmra.mxu2 %v2770_v8  ;;  %650 = vmatmul.bf16.vlgmr.msra.gmra.mxu0 %v2774_v9 }
  0x67   : > { %665 = vmatmul.bf16.vlgmr.msra.gmra.mxu1 %v2777_v10  ;;  %964 = vmatpush.bf16.msrb.mxu2 %v1954_v11 }
  0x6b   : > { %965 = vmatpush.bf16.msrb.mxu2 %v1953_v12 }
  0x6f   : > { %966 = vmatpush.bf16.msrb.mxu2 %v1952_v13 }
  0x73   : > { %967 = vmatpush.bf16.msrb.mxu2 %v1951_v14 }
  0x76   : > { %680 = vmatmul.bf16.gmra.mxu2 %v2782_v15  ;;  %655 = vmatmul.bf16.gmra.mxu0 %v2785_v16 }
  0x77   : > { %670 = vmatmul.bf16.gmra.mxu1 %v2788_v17  ;;  %968 = vmatpush.bf16.msrb.mxu2 %v1950_v18 }
  0x7b   : > { %969 = vmatpush.bf16.msrb.mxu2 %v1949_v19 }
  0x7f   : > { %970 = vmatpush.bf16.msrb.mxu2 %v1948_v20 }
  0x83   : > { %971 = vmatpush.bf16.msrb.mxu2 %v1947_v21 }
  0x86   : > { %685 = vmatmul.bf16.gmra.mxu2 %v2794_v22  ;;  %660 = vmatmul.bf16.gmra.mxu0 %v2797_v23 }
  0x96   : > { %972 = vmatmul.bf16.vlgmr.msrb.gmra.mxu2 %v888_v26 }
  0xa6   : > { %977 = vmatmul.bf16.gmra.mxu2 %v889_v29  ;;  %v1946_v29 = vld [vmem:[#allocation13 + $0x38] sm:$0xff] }
  0xa7   : > { %759 = vmatpush.bf16.msrb.mxu1 %v1946_v29 }
  0xb6   : > { %982 = vmatmul.bf16.gmra.mxu2 %v890_v32  ;;  %v1945_v32 = vld [vmem:[#allocation13 + $0x30] sm:$0xff] }
  0xb7   : > { %760 = vmatpush.bf16.msrb.mxu1 %v1945_v32 }
  0xc6   : > { %987 = vmatmul.bf16.gmra.mxu2 %v891_v35 }
  0xd6   : > { %992 = vmatmul.bf16.gmra.mxu2 %v892_v42 }
  0xe3   : > { %v651_v36 = vpop.f32.mrf.mxu0 }
  0xe4   : > { %v666_v37 = vpop.f32.mrf.mxu1  ;;  %v652_v43 = vadd.f32 %v2192_v41, %v651_v36  ;;  %v1944_v36 = vld [vmem:[#allocation13 + $0x28] sm:$0xff] }
  0xe5   : > { %v667_v44 = vadd.f32 %v2192_v41, %v666_v37  ;;  %v2845_v37 = vld [vmem:[%s2755_s27 + $0x50] sm:$0xff]  ;;  %761 = vmatpush.bf16.msrb.mxu1 %v1944_v36 }
  0xe9   : > { %v676_v38 = vpop.f32.mrf.mxu2 }
  0xea   : > { %v677_v52 = vadd.f32 %v2192_v41, %v676_v38  ;;  %v2848_v38 = vld [vmem:[%s2755_s27 + $0x58] sm:$0xff] }
  0xeb   : > { %v653_v45 = vpop.f32.mrf.mxu0  ;;  %v893_v42 = vpack.c.bf16 %v2848_v38, %v2845_v37 }
  0xec   : > { %v668_v46 = vpop.f32.mrf.mxu1  ;;  %v654_v47 = vadd.f32 %v2192_v41, %v653_v45  ;;  %v1941_v45 = vld [vmem:[#allocation13 + $0x10] sm:$0xff] }
  0xed   : > { %v669_v48 = vadd.f32 %v2192_v41, %v668_v46  ;;  %997 = vmatmul.bf16.gmra.mxu2 %v893_v42  ;;  %v2896_v42 = vld [vmem:[%s3224_s7] ss:$0 sm:$0xff] }
  0xee   : > { %v1976_v50 = vpack.c.bf16 %v654_v47, %v652_v43  ;;  %v1940_v47 = vld [vmem:[#allocation13 + $0x8] sm:$0xff] }
  0xef   : > { %v1991_v51 = vpack.c.bf16 %v669_v48, %v667_v44  ;;  %v1942_v44 = vld [vmem:[#allocation13 + $0x18] sm:$0xff]  ;;  %v2853_v48 = vld [vmem:[%s2755_s27 + $0x60] sm:$0xff] }
  0xf0   : > { %1977 = vst [vmem:[#allocation2 + $0x30] sm:$0xff] %v1976_v50   ;;  %v1939_v50 = vld [vmem:[#allocation13] sm:$0xff] }
  0xf1   : > { %v678_v49 = vpop.f32.mrf.mxu2  ;;  %2055 = vst [vmem:[#allocation2 + $0x10] sm:$0xff] %v1991_v51  }
  0xf2   : > { %v679_v53 = vadd.f32 %v2192_v41, %v678_v49  ;;  %v2856_v49 = vld [vmem:[%s2755_s27 + $0x68] sm:$0xff] }
  0xf3   : > { %v656_v55 = vpop.f32.mrf.mxu0  ;;  %v894_v51 = vpack.c.bf16 %v2856_v49, %v2853_v48 }
  0xf4   : > { %v2001_v54 = vpack.c.bf16 %v679_v53, %v677_v52  ;;  %v671_v56 = vpop.f32.mrf.mxu1  ;;  %v657_v58 = vadd.f32 %v2192_v41, %v656_v55  ;;  %v2865_v55 = vld [vmem:[%s2755_s27 + $0x78] sm:$0xff] }
  0xf5   : > { %v672_v59 = vadd.f32 %v2192_v41, %v671_v56 }
  0xf6   : > { %2057 = vst [vmem:[#allocation2 + $0x20] sm:$0xff] %v2001_v54   ;;  %v2862_v54 = vld [vmem:[%s2755_s27 + $0x70] sm:$0xff]  ;;  %s2429_s27 = scalar_lea.hbm %s3226_s9, 256 }
  0xf7   : > { %p2431_p12 = scmp.lt.s32.totalorder %s2429_s27, %s2425_s0 }
  0xf8   : > { %v1958_v53 = vld [vmem:[#allocation2 + $0x10] sm:$0xff] }
  0xf9   : > { %v681_v57 = vpop.f32.mrf.mxu2  ;;  %p2432_p13 = por %p2431_p12, %p2430_p10 }
  0xfa   : > { %v682_v1 = vadd.f32 %v2192_v41, %v681_v57 }
  0xfb   : > { %v658_v60 = vpop.f32.mrf.mxu0  ;;  %p2433_p0 = pnand %p2432_p13, %p2428_p8 }
  0xfc   : > { %v673_v61 = vpop.f32.mrf.mxu1  ;;  %v659_v62 = vadd.f32 %v2192_v41, %v658_v60 }
  0xfd   : > { %v674_v63 = vadd.f32 %v2192_v41, %v673_v61  ;;  %v1960_v43 = vld [vmem:[#allocation2 + $0x20] sm:$0xff]  ;;  %1002 = vmatmul.bf16.gmra.mxu2 %v894_v51  ;;  %v1955_v61 = vld [vmem:[#allocation2 + $0x30] sm:$0xff] }
  0xfe   : > { %v1981_v3 = vpack.c.bf16 %v659_v62, %v657_v58  ;;  %v895_v58 = vpack.c.bf16 %v2865_v55, %v2862_v54 }
  0xff   : > { %v1996_v4 = vpack.c.bf16 %v674_v63, %v672_v59 }
 0x100   : > { %2053 = vst [vmem:[#allocation2] sm:$0xff] %v1981_v3  }
 0x101   : > { %v683_v0 = vpop.f32.mrf.mxu2  ;;  %2056 = vst [vmem:[#allocation2 + $0x8] sm:$0xff] %v1996_v4  }
 0x102   : > { %v684_v2 = vadd.f32 %v2192_v41, %v683_v0 }
 0x103   : > { %v661_v6 = vpop.f32.mrf.mxu0 }
 0x104   : > { %v2006_v5 = vpack.c.bf16 %v684_v2, %v682_v1  ;;  %v662_v11 = vadd.f32 %v2192_v41, %v661_v6 }
 0x106   : > { %2058 = vst [vmem:[#allocation2 + $0x28] sm:$0xff] %v2006_v5  }
 0x107   : > { %v1956_v59 = vld [vmem:[#allocation2] sm:$0xff] }
 0x108   : > { %v1959_v46 = vld [vmem:[#allocation2 + $0x8] sm:$0xff] }
 0x109   : > { %v686_v7 = vpop.f32.mrf.mxu2 }
 0x10a   : > { %v687_v18 = vadd.f32 %v2192_v41, %v686_v7 }
 0x10b   : > { %v663_v12 = vpop.f32.mrf.mxu0 }
 0x10c   : > { %v664_v13 = vadd.f32 %v2192_v41, %v663_v12 }
 0x10d   : > { %v1961_v35 = vld [vmem:[#allocation2 + $0x28] sm:$0xff]  ;;  %1007 = vmatmul.bf16.gmra.mxu2 %v895_v58 }
 0x10e   : > { %v1986_v20 = vpack.c.bf16 %v664_v13, %v662_v11 }
 0x110   : > { %2054 = vst [vmem:[#allocation2 + $0x18] sm:$0xff] %v1986_v20  }
 0x111   : > { %v688_v14 = vpop.f32.mrf.mxu2 }
 0x112   : > { %v689_v19 = vadd.f32 %v2192_v41, %v688_v14  ;;  %v1943_v41 = vld [vmem:[#allocation13 + $0x20] sm:$0xff] }
 0x113   : > { %762 = vmatpush.bf16.msrb.mxu1 %v1943_v41 }
 0x114   : > { %v2011_v21 = vpack.c.bf16 %v689_v19, %v687_v18 }
 0x116   : > { %2059 = vst [vmem:[#allocation2 + $0x38] sm:$0xff] %v2011_v21  }
 0x117   : > { %763 = vmatpush.bf16.msrb.mxu1 %v1942_v44  ;;  %v1957_v56 = vld [vmem:[#allocation2 + $0x18] sm:$0xff] }
 0x119   : > { %v973_v52 = vpop.f32.mrf.mxu2 }
 0x11b   : > { %764 = vmatpush.bf16.msrb.mxu1 %v1941_v45 }
 0x11d   : > { %v1962_v26 = vld [vmem:[#allocation2 + $0x38] sm:$0xff] }
 0x11e   : > { %1085 = vmatpush.bf16.xpose.msra.mxu3 %v1962_v26 }
 0x11f   : > { %765 = vmatpush.bf16.msrb.mxu1 %v1940_v47 }
 0x121   : > { %v975_v57 = vpop.f32.mrf.mxu2 }
 0x123   : > { %766 = vmatpush.bf16.msrb.mxu1 %v1939_v50 }
 0x126   : > { %1086 = vmatpush.bf16.xpose.msra.mxu3 %v1961_v35  ;;  %767 = vmatmul.bf16.vlgmr.msrb.gmra.mxu1 %v2774_v9  ;;  %v2873_v9 = vld [vmem:[%s3222_s5] ss:$0 sm:$0xff] }
 0x127   : > { %v974_v62 = vadd.f32 %v2873_v9, %v973_v52  ;;  %v976_v63 = vadd.f32 %v2873_v9, %v975_v57 }
 0x129   : > { %v978_v60 = vpop.f32.mrf.mxu2  ;;  %v1013_v1 = vpack.c.bf16 %v976_v63, %v974_v62 }
 0x12a   : > { %v979_v3 = vadd.f32 %v2873_v9, %v978_v60 }
 0x12e   : > { %1087 = vmatpush.bf16.xpose.msra.mxu3 %v1960_v43 }
 0x131   : > { %v980_v0 = vpop.f32.mrf.mxu2 }
 0x136   : > { %1088 = vmatpush.bf16.xpose.msra.mxu3 %v1959_v46  ;;  %772 = vmatmul.bf16.gmra.mxu1 %v2785_v16  ;;  %v981_v16 = vadd.f32 %v2873_v9, %v980_v0 }
 0x138   : > { %v1014_v4 = vpack.c.bf16 %v981_v16, %v979_v3 }
 0x139   : > { %v983_v2 = vpop.f32.mrf.mxu2 }
 0x13a   : > { %v984_v7 = vadd.f32 %v2873_v9, %v983_v2 }
 0x13e   : > { %1089 = vmatpush.bf16.xpose.msra.mxu3 %v1958_v53 }
 0x141   : > { %v985_v5 = vpop.f32.mrf.mxu2 }
 0x142   : > { %v986_v11 = vadd.f32 %v2873_v9, %v985_v5 }
 0x144   : > { %v1015_v12 = vpack.c.bf16 %v986_v11, %v984_v7 }
 0x146   : > { %1090 = vmatpush.bf16.xpose.msra.mxu3 %v1957_v56  ;;  %777 = vmatmul.bf16.gmra.mxu1 %v2797_v23 }
 0x149   : > { %v988_v6 = vpop.f32.mrf.mxu2 }
 0x14a   : > { %v989_v13 = vadd.f32 %v2873_v9, %v988_v6 }
 0x14e   : > { %1091 = vmatpush.bf16.xpose.msra.mxu3 %v1956_v59  ;;  %v1134_v59 = vlaneseq }
 0x150   : > { %v2906_v63 = vand.u32 127, %v1134_v59 }
 0x151   : > { %v990_v23 = vpop.f32.mrf.mxu2 }
 0x152   : > { %v991_v14 = vadd.f32 %v2873_v9, %v990_v23  ;;  %vm1136_vm0 = vcmp.lt.s32.totalorder %v2906_v63, 64 }
 0x154   : > { %v1016_v19 = vpack.c.bf16 %v991_v14, %v989_v13 }
 0x156   : > { %1092 = vmatpush.bf16.xpose.msra.mxu3 %v1955_v61  ;;  %782 = vmatmul.bf16.gmra.mxu1 %v2777_v10 }
 0x159   : > { %v993_v18 = vpop.f32.mrf.mxu2 }
 0x15a   : > { %v994_v20 = vadd.f32 %v2873_v9, %v993_v18 }
 0x15d   : > { %1093 = vmatmul.bf16.vlgmr.msra.gmra.mxu3 %v1013_v1 }
 0x161   : > { %v995_v10 = vpop.f32.mrf.mxu2 }
 0x162   : > { %v996_v21 = vadd.f32 %v2873_v9, %v995_v10 }
 0x164   : > { %v1017_v26 = vpack.c.bf16 %v996_v21, %v994_v20 }
 0x166   : > { %787 = vmatmul.bf16.gmra.mxu1 %v2788_v17 }
 0x16d   : > { %1098 = vmatmul.bf16.gmra.mxu3 %v1014_v4 }
 0x170   : > { %v998_v17 = vpop.f32.mrf.mxu2 }
 0x171   : > { %v999_v29 = vadd.f32 %v2873_v9, %v998_v17 }
 0x176   : > { %792 = vmatmul.bf16.gmra.mxu1 %v2770_v8 }
 0x178   : > { %v1000_v32 = vpop.f32.mrf.mxu2 }
 0x179   : > { %v1001_v35 = vadd.f32 %v2873_v9, %v1000_v32 }
 0x17b   : > { %v1018_v36 = vpack.c.bf16 %v1001_v35, %v999_v29 }
 0x17d   : > { %1103 = vmatmul.bf16.gmra.mxu3 %v1015_v12 }
 0x180   : > { %v1003_v41 = vpop.f32.mrf.mxu2 }
 0x181   : > { %v1004_v45 = vadd.f32 %v2873_v9, %v1003_v41 }
 0x186   : > { %797 = vmatmul.bf16.gmra.mxu1 %v2782_v15 }
 0x18d   : > { %1108 = vmatmul.bf16.gmra.mxu3 %v1016_v19 }
 0x196   : > { %802 = vmatmul.bf16.gmra.mxu1 %v2794_v22  ;;  %v1005_v22 = vpop.f32.mrf.mxu2 }
 0x197   : > { %v1006_v46 = vadd.f32 %v2873_v9, %v1005_v22 }
 0x199   : > { %v1019_v50 = vpack.c.bf16 %v1006_v46, %v1004_v45 }
 0x19d   : > { %1113 = vmatmul.bf16.gmra.mxu3 %v1017_v26 }
 0x19e   : > { %v1008_v52 = vpop.f32.mrf.mxu2 }
 0x19f   : > { %v1009_v60 = vadd.f32 %v2873_v9, %v1008_v52 }
 0x1a3   : > { %v768_v8 = vpop.f32.mrf.mxu1 }
 0x1a4   : > { %v769_v43 = vadd.f32 %v2896_v42, %v768_v8 }
 0x1a6   : > { %v1010_v58 = vpop.f32.mrf.mxu2 }
 0x1a7   : > { %v1011_v61 = vadd.f32 %v2873_v9, %v1010_v58 }
 0x1a9   : > { %v1020_v0 = vpack.c.bf16 %v1011_v61, %v1009_v60 }
 0x1ab   : > { %v770_v15 = vpop.f32.mrf.mxu1 }
 0x1ac   : > { %v771_v44 = vadd.f32 %v2896_v42, %v770_v15 }
 0x1ad   : > { %1118 = vmatmul.bf16.gmra.mxu3 %v1018_v36 }
 0x1ae   : > { %v2016_v47 = vpack.c.bf16 %v771_v44, %v769_v43 }
 0x1b0   : > { %2017 = vst [vmem:[#allocation3] sm:$0xff] %v2016_v47  }
 0x1b3   : > { %v773_v51 = vpop.f32.mrf.mxu1 }
 0x1b4   : > { %v774_v53 = vadd.f32 %v2896_v42, %v773_v51 }
 0x1bb   : > { %v775_v56 = vpop.f32.mrf.mxu1 }
 0x1bc   : > { %v776_v57 = vadd.f32 %v2896_v42, %v775_v56 }
 0x1bd   : > { %1123 = vmatmul.bf16.gmra.mxu3 %v1019_v50 }
 0x1be   : > { %v2021_v62 = vpack.c.bf16 %v776_v57, %v774_v53 }
 0x1c0   : > { %2060 = vst [vmem:[#allocation3 + $0x18] sm:$0xff] %v2021_v62  }
 0x1c3   : > { %v778_v1 = vpop.f32.mrf.mxu1 }
 0x1c4   : > { %v779_v16 = vadd.f32 %v2896_v42, %v778_v1 }
 0x1cb   : > { %v780_v4 = vpop.f32.mrf.mxu1 }
 0x1cc   : > { %v781_v9 = vadd.f32 %v2896_v42, %v780_v4 }
 0x1cd   : > { %1128 = vmatmul.bf16.gmra.mxu3 %v1020_v0 }
 0x1ce   : > { %v2026_v5 = vpack.c.bf16 %v781_v9, %v779_v16 }
 0x1d0   : > { %2061 = vst [vmem:[#allocation3 + $0x10] sm:$0xff] %v2026_v5  }
 0x1d3   : > { %v783_v11 = vpop.f32.mrf.mxu1 }
 0x1d4   : > { %v784_v13 = vadd.f32 %v2896_v42, %v783_v11 }
 0x1db   : > { %v785_v14 = vpop.f32.mrf.mxu1 }
 0x1dc   : > { %v786_v18 = vadd.f32 %v2896_v42, %v785_v14 }
 0x1de   : > { %v2031_v19 = vpack.c.bf16 %v786_v18, %v784_v13  ;;  %v1965_v18 = vld [vmem:[#allocation3 + $0x10] sm:$0xff] }
 0x1e0   : > { %v1094_v2 = vpop.f32.mrf.mxu3  ;;  %2062 = vst [vmem:[#allocation3 + $0x20] sm:$0xff] %v2031_v19  }
 0x1e1   : > { %v2911_v3 = vsel %vm1136_vm0, %v1094_v2, -1e+30 }
 0x1e2   : > { %1153 = vmax.xlane.f32.xlu0 %v2911_v3 }
 0x1e3   : > { %v788_v21 = vpop.f32.mrf.mxu1 }
 0x1e4   : > { %v789_v29 = vadd.f32 %v2896_v42, %v788_v21 }
 0x1e8   : > { %v1096_v6 = vpop.f32.mrf.mxu3 }
 0x1e9   : > { %v2918_v7 = vsel %vm1136_vm0, %v1096_v6, -1e+30  ;;  %v1966_v6 = vld [vmem:[#allocation3 + $0x20] sm:$0xff] }
 0x1ea   : > { %1155 = vmax.xlane.f32.xlu0 %v2918_v7 }
 0x1eb   : > { %v790_v32 = vpop.f32.mrf.mxu1 }
 0x1ec   : > { %v791_v35 = vadd.f32 %v2896_v42, %v790_v32 }
 0x1ee   : > { %v2036_v36 = vpack.c.bf16 %v791_v35, %v789_v29  ;;  %v1963_v29 = vld [vmem:[#allocation3] sm:$0xff] }
 0x1f0   : > { %v1099_v12 = vpop.f32.mrf.mxu3  ;;  %2063 = vst [vmem:[#allocation3 + $0x28] sm:$0xff] %v2036_v36  }
 0x1f1   : > { %v2923_v23 = vsel %vm1136_vm0, %v1099_v12, -1e+30 }
 0x1f2   : > { %1157 = vmax.xlane.f32.xlu1 %v2923_v23 }
 0x1f3   : > { %v793_v43 = vpop.f32.mrf.mxu1 }
 0x1f4   : > { %v794_v22 = vadd.f32 %v2896_v42, %v793_v43 }
 0x1f7   : > { %v1967_v5 = vld [vmem:[#allocation3 + $0x28] sm:$0xff] }
 0x1f8   : > { %v1101_v10 = vpop.f32.mrf.mxu3 }
 0x1f9   : > { %v2930_v20 = vsel %vm1136_vm0, %v1101_v10, -1e+30 }
 0x1fa   : > { %1159 = vmax.xlane.f32.xlu1 %v2930_v20 }
 0x1fb   : > { %v795_v45 = vpop.f32.mrf.mxu1 }
 0x1fc   : > { %v796_v46 = vadd.f32 %v2896_v42, %v795_v45 }
 0x1fe   : > { %v2041_v47 = vpack.c.bf16 %v796_v46, %v794_v22 }
 0x200   : > { %v1104_v26 = vpop.f32.mrf.mxu3  ;;  %2064 = vst [vmem:[#allocation3 + $0x8] sm:$0xff] %v2041_v47  }
 0x201   : > { %v2935_v17 = vsel %vm1136_vm0, %v1104_v26, -1e+30 }
 0x202   : > { %1161 = vmax.xlane.f32.xlu2 %v2935_v17 }
 0x203   : > { %v798_v52 = vpop.f32.mrf.mxu1 }
 0x204   : > { %v799_v57 = vadd.f32 %v2896_v42, %v798_v52 }
 0x207   : > { %v1968_v9 = vld [vmem:[#allocation3 + $0x8] sm:$0xff] }
 0x208   : > { %v1106_v8 = vpop.f32.mrf.mxu3 }
 0x209   : > { %v2942_v41 = vsel %vm1136_vm0, %v1106_v8, -1e+30 }
 0x20a   : > { %1163 = vmax.xlane.f32.xlu2 %v2942_v41 }
 0x20b   : > { %v800_v58 = vpop.f32.mrf.mxu1 }
 0x20c   : > { %v801_v59 = vadd.f32 %v2896_v42, %v800_v58 }
 0x20e   : > { %v2046_v60 = vpack.c.bf16 %v801_v59, %v799_v57 }
 0x210   : > { %v1109_v15 = vpop.f32.mrf.mxu3  ;;  %2065 = vst [vmem:[#allocation3 + $0x30] sm:$0xff] %v2046_v60  }
 0x211   : > { %v2947_v44 = vsel %vm1136_vm0, %v1109_v15, -1e+30 }
 0x212   : > { %1165 = vmax.xlane.f32.xlu0 %v2947_v44 }
 0x213   : > { %v803_v61 = vpop.f32.mrf.mxu1 }
 0x214   : > { %v804_v62 = vadd.f32 %v2896_v42, %v803_v61 }
 0x217   : > { %v1969_v4 = vld [vmem:[#allocation3 + $0x30] sm:$0xff] }
 0x218   : > { %v1111_v50 = vpop.f32.mrf.mxu3 }
 0x219   : > { %v2954_v51 = vsel %vm1136_vm0, %v1111_v50, -1e+30 }
 0x21a   : > { %1167 = vmax.xlane.f32.xlu1 %v2954_v51 }
 0x21b   : > { %v805_v0 = vpop.f32.mrf.mxu1 }
 0x21c   : > { %v806_v1 = vadd.f32 %v2896_v42, %v805_v0  ;;  %v1964_v42 = vld [vmem:[#allocation3 + $0x18] sm:$0xff] }
 0x21e   : > { %v2051_v2 = vpack.c.bf16 %v806_v1, %v804_v62 }
 0x220   : > { %v1114_v53 = vpop.f32.mrf.mxu3  ;;  %2066 = vst [vmem:[#allocation3 + $0x38] sm:$0xff] %v2051_v2  }
 0x221   : > { %v2959_v56 = vsel %vm1136_vm0, %v1114_v53, -1e+30 }
 0x222   : > { %1169 = vmax.xlane.f32.xlu1 %v2959_v56 }
 0x227   : > { %v1970_v16 = vld [vmem:[#allocation3 + $0x38] sm:$0xff] }
 0x228   : > { %1385 = vmatpush.bf16.msrb.mxu0 %v1970_v16  ;;  %v1116_v14 = vpop.f32.mrf.mxu3 }
 0x229   : > { %v2976_v43 = vsel %vm1136_vm0, %v1116_v14, -1e+30 }
 0x22c   : > { %1386 = vmatpush.bf16.msrb.mxu0 %v1969_v4 }
 0x230   : > { %1387 = vmatpush.bf16.msrb.mxu0 %v1968_v9  ;;  %v1119_v32 = vpop.f32.mrf.mxu3 }
 0x234   : > { %1388 = vmatpush.bf16.msrb.mxu0 %v1967_v5 }
 0x238   : > { %1389 = vmatpush.bf16.msrb.mxu0 %v1966_v6 }
 0x23c   : > { %1390 = vmatpush.bf16.msrb.mxu0 %v1965_v18 }
 0x240   : > { %1391 = vmatpush.bf16.msrb.mxu0 %v1964_v42 }
 0x244   : > { %1392 = vmatpush.bf16.msrb.mxu0 %v1963_v29 }
 0x255   : > { %v1154_v11 = vpop.xlane.xlu0 %1153 }
 0x256   : > { %v1185_v12 = vsub.f32 %v2911_v3, %v1154_v11 }
 0x258   : > { %v1201_v13 = vmul.f32 1.442695, %v1185_v12 }
 0x25a   : > { %2195 = vpow2.f32 %v1201_v13 }
 0x25d   : > { %v1156_v19 = vpop.xlane.xlu0 %1155 }
 0x25e   : > { %v1186_v10 = vsub.f32 %v2918_v7, %v1156_v19  ;;  %v1121_v7 = vpop.f32.mrf.mxu3 }
 0x260   : > { %v2968_v21 = vpop.eup %2195  ;;  %v1203_v26 = vmul.f32 1.442695, %v1186_v10 }
 0x261   : > { %1233 = vadd.xlane.f32.xlu2 %v2968_v21 }
 0x262   : > { %2197 = vpow2.f32 %v1203_v26 }
 0x265   : > { %v1158_v3 = vpop.xlane.xlu1 %1157 }
 0x266   : > { %v1187_v35 = vsub.f32 %v2923_v23, %v1158_v3  ;;  %v2985_v23 = vsel %vm1136_vm0, %v1119_v32, -1e+30  ;;  %v1124_v52 = vpop.f32.mrf.mxu3 }
 0x268   : > { %v2972_v36 = vpop.eup %2197  ;;  %v1205_v8 = vmul.f32 1.442695, %v1187_v35 }
 0x269   : > { %1235 = vadd.xlane.f32.xlu0 %v2972_v36  ;;  %1171 = vmax.xlane.f32.xlu2 %v2976_v43 }
 0x26a   : > { %2199 = vpow2.f32 %v1205_v8 }
 0x26d   : > { %v1160_v15 = vpop.xlane.xlu1 %1159 }
 0x26e   : > { %v1188_v22 = vsub.f32 %v2930_v20, %v1160_v15  ;;  %v2994_v20 = vsel %vm1136_vm0, %v1121_v7, -1e+30  ;;  %v1126_v62 = vpop.f32.mrf.mxu3 }
 0x270   : > { %v2981_v45 = vpop.eup %2199  ;;  %v1207_v46 = vmul.f32 1.442695, %v1188_v22 }
 0x271   : > { %1237 = vadd.xlane.f32.xlu0 %v2981_v45  ;;  %1173 = vmax.xlane.f32.xlu2 %v2985_v23 }
 0x272   : > { %2201 = vpow2.f32 %v1207_v46 }
 0x275   : > { %v1162_v47 = vpop.xlane.xlu2 %1161 }
 0x276   : > { %v1189_v50 = vsub.f32 %v2935_v17, %v1162_v47  ;;  %v3003_v17 = vsel %vm1136_vm0, %v1124_v52, -1e+30  ;;  %v1129_v4 = vpop.f32.mrf.mxu3 }
 0x278   : > { %v2990_v53 = vpop.eup %2201  ;;  %v1209_v57 = vmul.f32 1.442695, %v1189_v50 }
 0x279   : > { %1239 = vadd.xlane.f32.xlu1 %v2990_v53  ;;  %1175 = vmax.xlane.f32.xlu0 %v2994_v20 }
 0x27a   : > { %2203 = vpow2.f32 %v1209_v57 }
 0x27d   : > { %v1164_v58 = vpop.xlane.xlu2 %1163 }
 0x27e   : > { %v1190_v59 = vsub.f32 %v2942_v41, %v1164_v58  ;;  %v3012_v41 = vsel %vm1136_vm0, %v1126_v62, -1e+30  ;;  %v1131_v12 = vpop.f32.mrf.mxu3 }
 0x27f   : > { %v3030_v42 = vsel %vm1136_vm0, %v1131_v12, -1e+30 }
 0x280   : > { %v2999_v60 = vpop.eup %2203  ;;  %v1211_v61 = vmul.f32 1.442695, %v1190_v59 }
 0x281   : > { %1241 = vadd.xlane.f32.xlu1 %v2999_v60  ;;  %1177 = vmax.xlane.f32.xlu0 %v3003_v17 }
 0x282   : > { %2205 = vpow2.f32 %v1211_v61 }
 0x285   : > { %v1166_v0 = vpop.xlane.xlu0 %1165 }
 0x286   : > { %v1191_v1 = vsub.f32 %v2947_v44, %v1166_v0  ;;  %v3021_v44 = vsel %vm1136_vm0, %v1129_v4, -1e+30 }
 0x288   : > { %v3008_v2 = vpop.eup %2205  ;;  %v1213_v16 = vmul.f32 1.442695, %v1191_v1 }
 0x289   : > { %1243 = vadd.xlane.f32.xlu2 %v3008_v2  ;;  %1179 = vmax.xlane.f32.xlu1 %v3012_v41 }
 0x28a   : > { %2207 = vpow2.f32 %v1213_v16 }
 0x28d   : > { %v1168_v9 = vpop.xlane.xlu1 %1167 }
 0x28e   : > { %v1192_v5 = vsub.f32 %v2954_v51, %v1168_v9 }
 0x290   : > { %v3017_v6 = vpop.eup %2207  ;;  %v1215_v11 = vmul.f32 1.442695, %v1192_v5 }
 0x291   : > { %1245 = vadd.xlane.f32.xlu2 %v3017_v6  ;;  %1181 = vmax.xlane.f32.xlu1 %v3021_v44 }
 0x292   : > { %2209 = vpow2.f32 %v1215_v11 }
 0x295   : > { %v1170_v13 = vpop.xlane.xlu1 %1169 }
 0x296   : > { %v1193_v14 = vsub.f32 %v2959_v56, %v1170_v13 }
 0x298   : > { %v3026_v18 = vpop.eup %2209  ;;  %v1217_v51 = vmul.f32 1.442695, %v1193_v14 }
 0x299   : > { %1247 = vadd.xlane.f32.xlu0 %v3026_v18  ;;  %1183 = vmax.xlane.f32.xlu2 %v3030_v42 }
 0x29a   : > { %2211 = vpow2.f32 %v1217_v51 }
 0x2a0   : > { %v3034_v19 = vpop.eup %2211 }
 0x2a1   : > { %1249 = vadd.xlane.f32.xlu0 %v3034_v19 }
 0x2d4   : > { %v1234_v10 = vpop.xlane.xlu2 %1233 }
 0x2d5   : > { %2213 = vrcp.f32 %v1234_v10 }
 0x2db   : > { %v2214_v56 = vpop.eup %2213 }
 0x2dc   : > { %v1236_v26 = vpop.xlane.xlu0 %1235  ;;  %v1172_v29 = vpop.xlane.xlu2 %1171  ;;  %v1281_v32 = vmul.f32 %v2214_v56, %v2968_v21 }
 0x2dd   : > { %2215 = vrcp.f32 %v1236_v26  ;;  %v1194_v63 = vsub.f32 %v2976_v43, %v1172_v29 }
 0x2de   : > { %1297 = vst [vmem:[%s3040_s26] sm:$0xff] %v1281_v32 }
 0x2df   : > { %v1219_v3 = vmul.f32 1.442695, %v1194_v63 }
 0x2e1   : > { %2217 = vpow2.f32 %v1219_v3 }
 0x2e3   : > { %v2216_v35 = vpop.eup %2215 }
 0x2e4   : > { %v1238_v8 = vpop.xlane.xlu0 %1237  ;;  %v1174_v7 = vpop.xlane.xlu2 %1173  ;;  %v1282_v15 = vmul.f32 %v2216_v35, %v2972_v36 }
 0x2e5   : > { %2219 = vrcp.f32 %v1238_v8  ;;  %v1195_v22 = vsub.f32 %v2985_v23, %v1174_v7 }
 0x2e6   : > { %1298 = vst [vmem:[%s3040_s26 + $0x8] sm:$0xff] %v1282_v15  ;;  %v1313_v21 = vpack.c.bf16 %v1282_v15, %v1281_v32 }
 0x2e7   : > { %v3046_v46 = vpop.eup %2217  ;;  %v1221_v43 = vmul.f32 1.442695, %v1195_v22 }
 0x2e8   : > { %1393 = vmatmul.bf16.vlgmr.msrb.gmra.mxu0 %v1313_v21  ;;  %1251 = vadd.xlane.f32.xlu1 %v3046_v46 }
 0x2e9   : > { %2221 = vpow2.f32 %v1221_v43 }
 0x2eb   : > { %v2220_v47 = vpop.eup %2219 }
 0x2ec   : > { %v1240_v50 = vpop.xlane.xlu1 %1239  ;;  %v1176_v52 = vpop.xlane.xlu0 %1175  ;;  %v1283_v57 = vmul.f32 %v2220_v47, %v2981_v45 }
 0x2ed   : > { %2223 = vrcp.f32 %v1240_v50  ;;  %v1196_v36 = vsub.f32 %v2994_v20, %v1176_v52 }
 0x2ee   : > { %1299 = vst [vmem:[%s3040_s26 + $0x10] sm:$0xff] %v1283_v57 }
 0x2ef   : > { %v3052_v23 = vpop.eup %2221  ;;  %v1223_v58 = vmul.f32 1.442695, %v1196_v36 }
 0x2f0   : > { %1253 = vadd.xlane.f32.xlu2 %v3052_v23 }
 0x2f1   : > { %2225 = vpow2.f32 %v1223_v58 }
 0x2f3   : > { %v2224_v59 = vpop.eup %2223 }
 0x2f4   : > { %v1242_v61 = vpop.xlane.xlu1 %1241  ;;  %v1178_v62 = vpop.xlane.xlu0 %1177  ;;  %v1284_v0 = vmul.f32 %v2224_v59, %v2990_v53 }
 0x2f5   : > { %2227 = vrcp.f32 %v1242_v61  ;;  %v1197_v1 = vsub.f32 %v3003_v17, %v1178_v62 }
 0x2f6   : > { %1300 = vst [vmem:[%s3040_s26 + $0x18] sm:$0xff] %v1284_v0  ;;  %v1314_v45 = vpack.c.bf16 %v1284_v0, %v1283_v57 }
 0x2f7   : > { %v3058_v16 = vpop.eup %2225  ;;  %v1225_v20 = vmul.f32 1.442695, %v1197_v1 }
 0x2f8   : > { %1398 = vmatmul.bf16.gmra.mxu0 %v1314_v45  ;;  %1255 = vadd.xlane.f32.xlu0 %v3058_v16 }
 0x2f9   : > { %2229 = vpow2.f32 %v1225_v20 }
 0x2fb   : > { %v2228_v4 = vpop.eup %2227 }
 0x2fc   : > { %v1244_v9 = vpop.xlane.xlu2 %1243  ;;  %v1180_v5 = vpop.xlane.xlu1 %1179  ;;  %v1285_v11 = vmul.f32 %v2228_v4, %v2999_v60 }
 0x2fd   : > { %2231 = vrcp.f32 %v1244_v9  ;;  %v1198_v53 = vsub.f32 %v3012_v41, %v1180_v5 }
 0x2fe   : > { %1301 = vst [vmem:[%s3040_s26 + $0x20] sm:$0xff] %v1285_v11 }
 0x2ff   : > { %v3064_v17 = vpop.eup %2229  ;;  %v1227_v12 = vmul.f32 1.442695, %v1198_v53 }
 0x300   : > { %1257 = vadd.xlane.f32.xlu1 %v3064_v17 }
 0x301   : > { %2233 = vpow2.f32 %v1227_v12 }
 0x303   : > { %v2232_v13 = vpop.eup %2231 }
 0x304   : > { %v1246_v14 = vpop.xlane.xlu2 %1245  ;;  %v1182_v51 = vpop.xlane.xlu1 %1181  ;;  %v1286_v10 = vmul.f32 %v2232_v13, %v3008_v2 }
 0x305   : > { %2235 = vrcp.f32 %v1246_v14  ;;  %v1199_v56 = vsub.f32 %v3021_v44, %v1182_v51 }
 0x306   : > { %1302 = vst [vmem:[%s3040_s26 + $0x28] sm:$0xff] %v1286_v10  ;;  %v1315_v60 = vpack.c.bf16 %v1286_v10, %v1285_v11 }
 0x307   : > { %v3070_v26 = vpop.eup %2233  ;;  %v1229_v41 = vmul.f32 1.442695, %v1199_v56 }
 0x308   : > { %1403 = vmatmul.bf16.gmra.mxu0 %v1315_v60  ;;  %1259 = vadd.xlane.f32.xlu2 %v3070_v26 }
 0x309   : > { %2237 = vpow2.f32 %v1229_v41 }
 0x30b   : > { %v2236_v29 = vpop.eup %2235 }
 0x30c   : > { %v1248_v32 = vpop.xlane.xlu0 %1247  ;;  %v1184_v63 = vpop.xlane.xlu2 %1183  ;;  %v1287_v3 = vmul.f32 %v2236_v29, %v3017_v6 }
 0x30d   : > { %2239 = vrcp.f32 %v1248_v32  ;;  %v1200_v2 = vsub.f32 %v3030_v42, %v1184_v63 }
 0x30e   : > { %1303 = vst [vmem:[%s3040_s26 + $0x30] sm:$0xff] %v1287_v3 }
 0x30f   : > { %v3076_v44 = vpop.eup %2237  ;;  %v1231_v35 = vmul.f32 1.442695, %v1200_v2 }
 0x310   : > { %1261 = vadd.xlane.f32.xlu0 %v3076_v44 }
 0x311   : > { %2241 = vpow2.f32 %v1231_v35 }
 0x313   : > { %v2240_v8 = vpop.eup %2239 }
 0x314   : > { %v1250_v7 = vpop.xlane.xlu0 %1249  ;;  %v1288_v15 = vmul.f32 %v2240_v8, %v3026_v18  ;;  %v3086_v18 = vstv %s1434_s24 }
 0x315   : > { %2243 = vrcp.f32 %v1250_v7 }
 0x316   : > { %1304 = vst [vmem:[%s3040_s26 + $0x38] sm:$0xff] %v1288_v15  ;;  %v1316_v22 = vpack.c.bf16 %v1288_v15, %v1287_v3 }
 0x317   : > { %v3081_v6 = vpop.eup %2241 }
 0x318   : > { %1408 = vmatmul.bf16.gmra.mxu0 %v1316_v22  ;;  %1263 = vadd.xlane.f32.xlu1 %v3081_v6 }
 0x31b   : > { %v2244_v42 = vpop.eup %2243 }
 0x31c   : > { %v1289_v21 = vmul.f32 %v2244_v42, %v3034_v19 }
 0x31e   : > { %1305 = vst [vmem:[%s3040_s26 + $0x40] sm:$0xff] %v1289_v21 }
 0x35b   : > { %v1252_v43 = vpop.xlane.xlu1 %1251 }
 0x35c   : > { %2245 = vrcp.f32 %v1252_v43 }
 0x362   : > { %v2246_v47 = vpop.eup %2245 }
 0x363   : > { %v1254_v50 = vpop.xlane.xlu2 %1253  ;;  %v1290_v52 = vmul.f32 %v2246_v47, %v3046_v46 }
 0x364   : > { %2247 = vrcp.f32 %v1254_v50 }
 0x365   : > { %v1394_v57 = vpop.f32.mrf.mxu0  ;;  %1306 = vst [vmem:[%s3040_s26 + $0x48] sm:$0xff] %v1290_v52  ;;  %v1317_v36 = vpack.c.bf16 %v1290_v52, %v1289_v21 }
 0x366   : > { %v1436_v58 = vmul.f32 %v3086_v18, %v1394_v57 }
 0x367   : > { %1413 = vmatmul.bf16.gmra.mxu0 %v1317_v36 }
 0x368   : > { %v1452_v19 = vadd.f32 %v1436_v58, %v2802_v24 }
 0x36a   : > { %v2248_v59 = vpop.eup %2247  ;;  %1468 = vst [vmem:[%s3093_s21] sm:$0xff] %v1452_v19 }
 0x36b   : > { %v1256_v61 = vpop.xlane.xlu0 %1255  ;;  %v1291_v62 = vmul.f32 %v2248_v59, %v3052_v23 }
 0x36c   : > { %2249 = vrcp.f32 %v1256_v61 }
 0x36d   : > { %v1396_v46 = vpop.f32.mrf.mxu0  ;;  %1307 = vst [vmem:[%s3040_s26 + $0x50] sm:$0xff] %v1291_v62 }
 0x36e   : > { %v1437_v0 = vmul.f32 %v3086_v18, %v1396_v46 }
 0x370   : > { %v1453_v1 = vadd.f32 %v1437_v0, %v2805_v25 }
 0x372   : > { %v2250_v45 = vpop.eup %2249  ;;  %1469 = vst [vmem:[%s3093_s21 + $0x8] sm:$0xff] %v1453_v1 }
 0x373   : > { %v1258_v24 = vpop.xlane.xlu1 %1257  ;;  %v1292_v20 = vmul.f32 %v2250_v45, %v3058_v16 }
 0x374   : > { %2251 = vrcp.f32 %v1258_v24 }
 0x375   : > { %v1399_v4 = vpop.f32.mrf.mxu0  ;;  %1308 = vst [vmem:[%s3040_s26 + $0x58] sm:$0xff] %v1292_v20  ;;  %v1318_v9 = vpack.c.bf16 %v1292_v20, %v1291_v62 }
 0x376   : > { %v1438_v23 = vmul.f32 %v3086_v18, %v1399_v4 }
 0x377   : > { %1418 = vmatmul.bf16.gmra.mxu0 %v1318_v9 }
 0x378   : > { %v1454_v5 = vadd.f32 %v1438_v23, %v2810_v27 }
 0x37a   : > { %v2252_v11 = vpop.eup %2251  ;;  %1470 = vst [vmem:[%s3093_s21 + $0x10] sm:$0xff] %v1454_v5 }
 0x37b   : > { %v1260_v25 = vpop.xlane.xlu2 %1259  ;;  %v1293_v53 = vmul.f32 %v2252_v11, %v3064_v17 }
 0x37c   : > { %2253 = vrcp.f32 %v1260_v25 }
 0x37d   : > { %v1401_v12 = vpop.f32.mrf.mxu0  ;;  %1309 = vst [vmem:[%s3040_s26 + $0x60] sm:$0xff] %v1293_v53 }
 0x37e   : > { %v1439_v16 = vmul.f32 %v3086_v18, %v1401_v12 }
 0x380   : > { %v1455_v13 = vadd.f32 %v1439_v16, %v2813_v28 }
 0x382   : > { %v2254_v14 = vpop.eup %2253  ;;  %1471 = vst [vmem:[%s3093_s21 + $0x18] sm:$0xff] %v1455_v13 }
 0x383   : > { %v1262_v51 = vpop.xlane.xlu0 %1261  ;;  %v1294_v27 = vmul.f32 %v2254_v14, %v3070_v26 }
 0x384   : > { %2255 = vrcp.f32 %v1262_v51 }
 0x385   : > { %v1404_v10 = vpop.f32.mrf.mxu0  ;;  %1310 = vst [vmem:[%s3040_s26 + $0x68] sm:$0xff] %v1294_v27  ;;  %v1319_v56 = vpack.c.bf16 %v1294_v27, %v1293_v53 }
 0x386   : > { %v1440_v17 = vmul.f32 %v3086_v18, %v1404_v10 }
 0x387   : > { %1423 = vmatmul.bf16.gmra.mxu0 %v1319_v56 }
 0x388   : > { %v1456_v60 = vadd.f32 %v1440_v17, %v2818_v30 }
 0x38a   : > { %v2256_v41 = vpop.eup %2255  ;;  %1472 = vst [vmem:[%s3093_s21 + $0x20] sm:$0xff] %v1456_v60 }
 0x38b   : > { %v1264_v28 = vpop.xlane.xlu1 %1263  ;;  %v1295_v29 = vmul.f32 %v2256_v41, %v3076_v44 }
 0x38c   : > { %2257 = vrcp.f32 %v1264_v28 }
 0x38d   : > { %v1406_v32 = vpop.f32.mrf.mxu0  ;;  %1311 = vst [vmem:[%s3040_s26 + $0x70] sm:$0xff] %v1295_v29 }
 0x38e   : > { %v1441_v26 = vmul.f32 %v3086_v18, %v1406_v32 }
 0x390   : > { %v1457_v63 = vadd.f32 %v1441_v26, %v2821_v31 }
 0x392   : > { %v2258_v3 = vpop.eup %2257  ;;  %1473 = vst [vmem:[%s3093_s21 + $0x28] sm:$0xff] %v1457_v63 }
 0x393   : > { %v1296_v30 = vmul.f32 %v2258_v3, %v3081_v6 }
 0x395   : > { %v1409_v2 = vpop.f32.mrf.mxu0  ;;  %1312 = vst [vmem:[%s3040_s26 + $0x78] sm:$0xff] %v1296_v30  ;;  %v1320_v35 = vpack.c.bf16 %v1296_v30, %v1295_v29 }
 0x396   : > { %v1442_v44 = vmul.f32 %v3086_v18, %v1409_v2 }
 0x397   : > { %1428 = vmatmul.bf16.gmra.mxu0 %v1320_v35 }
 0x398   : > { %v1458_v8 = vadd.f32 %v1442_v44, %v2826_v33 }
 0x39a   : > { %1474 = vst [vmem:[%s3093_s21 + $0x30] sm:$0xff] %v1458_v8 }
 0x39d   : > { %v1411_v7 = vpop.f32.mrf.mxu0 }
 0x39e   : > { %v1443_v31 = vmul.f32 %v3086_v18, %v1411_v7 }
 0x3a0   : > { %v1459_v15 = vadd.f32 %v1443_v31, %v2829_v34 }
 0x3a2   : > { %1475 = vst [vmem:[%s3093_s21 + $0x38] sm:$0xff] %v1459_v15 }
 0x3a3   : > { %2436 = shalt.err (!%p2433_p0)
}
 0x3a4   : > { %s2544_s2 = smov 128   ;;  %s2545_s13 = smov 8  }
 0x3a5   : > { %2099 = dma.vmem_to_hbm [thread:$0]  (%p2704_p5), %s1505_s12, 2048, %s1507_s15, %s1485_s17, %s2544_s2, %s2544_s2, %s2545_s13  }
 0x3a6   : > { %s3261_s26 = sld [smem:[#allocation33_spill]]  ;;  %s1523_s28 = sshll.u32 %s3093_s21, 4  ;;  %s1524_s28 = int_to_ptr.vmem [resolvable:$true] %s1523_s28 }
 0x3a7   : > { %s1490_s11 = scalar_lea.sflag [#allocation16], %s2740_s4 }
 0x3ac   : > { %s1522_s24 = scalar_lea.hbm %s3261_s26, %s1971_s14  ;;  %s2457_s17 = scalar_lea.hbm %s3261_s26, 256 }
 0x3ad   : > { %s1525_s29 = sshll.u32 %s1522_s24, 4  ;;  %s1526_s29 = int_to_ptr.hbm [resolvable:$true] %s1525_s29 }
 0x3ae   : > { %s2451_s12 = sshra.s32 %s1526_s29, 4  ;;  %s2452_s12 = int_to_ptr.hbm [resolvable:$true] %s2451_s12 }
 0x3af   : > { %s2453_s15 = scalar_lea.hbm %s2452_s12, 128  ;;  %p2458_p2 = scmp.lt.s32.totalorder %s2452_s12, %s3261_s26 }
 0x3b0   : > { %p2454_p3 = scmp.ne.s32.totalorder %s2452_s12, %s2453_s15  ;;  %p2459_p1 = scmp.lt.s32.totalorder %s2457_s17, %s2453_s15 }
 0x3b2   : > { %p2455_p7 = pnand %p2454_p3, %p2704_p5  ;;  %p2460_p4 = por %p2459_p1, %p2458_p2 }
 0x3b4   : > { %p2456_p9 = pneg %p2455_p7 }
 0x3b6   : > { %p2461_p8 = pnand %p2460_p4, %p2456_p9 }
 0x3e4   : > { %v1414_v33 = vpop.f32.mrf.mxu0 }
 0x3e5   : > { %v1444_v34 = vmul.f32 %v3086_v18, %v1414_v33 }
 0x3e7   : > { %v1460_v22 = vadd.f32 %v1444_v34, %v2834_v39 }
 0x3e9   : > { %1476 = vst [vmem:[%s3093_s21 + $0x40] sm:$0xff] %v1460_v22 }
 0x3ec   : > { %v1416_v6 = vpop.f32.mrf.mxu0 }
 0x3ed   : > { %v1445_v42 = vmul.f32 %v3086_v18, %v1416_v6 }
 0x3ef   : > { %v1461_v21 = vadd.f32 %v1445_v42, %v2837_v40 }
 0x3f1   : > { %1477 = vst [vmem:[%s3093_s21 + $0x48] sm:$0xff] %v1461_v21 }
 0x3f4   : > { %v1419_v43 = vpop.f32.mrf.mxu0 }
 0x3f5   : > { %v1446_v47 = vmul.f32 %v3086_v18, %v1419_v43 }
 0x3f7   : > { %v1462_v50 = vadd.f32 %v1446_v47, %v2845_v37 }
 0x3f9   : > { %1478 = vst [vmem:[%s3093_s21 + $0x50] sm:$0xff] %v1462_v50 }
 0x3fc   : > { %v1421_v52 = vpop.f32.mrf.mxu0 }
 0x3fd   : > { %v1447_v39 = vmul.f32 %v3086_v18, %v1421_v52 }
 0x3ff   : > { %v1463_v57 = vadd.f32 %v1447_v39, %v2848_v38 }
 0x401   : > { %1479 = vst [vmem:[%s3093_s21 + $0x58] sm:$0xff] %v1463_v57 }
 0x404   : > { %v1424_v36 = vpop.f32.mrf.mxu0 }
 0x405   : > { %v1448_v40 = vmul.f32 %v3086_v18, %v1424_v36 }
 0x407   : > { %v1464_v58 = vadd.f32 %v1448_v40, %v2853_v48 }
 0x409   : > { %1480 = vst [vmem:[%s3093_s21 + $0x60] sm:$0xff] %v1464_v58 }
 0x40c   : > { %v1426_v19 = vpop.f32.mrf.mxu0 }
 0x40d   : > { %v1449_v37 = vmul.f32 %v3086_v18, %v1426_v19 }
 0x40f   : > { %v1465_v59 = vadd.f32 %v1449_v37, %v2856_v49 }
 0x411   : > { %1481 = vst [vmem:[%s3093_s21 + $0x68] sm:$0xff] %v1465_v59 }
 0x414   : > { %v1429_v61 = vpop.f32.mrf.mxu0 }
 0x415   : > { %v1450_v62 = vmul.f32 %v3086_v18, %v1429_v61 }
 0x417   : > { %v1466_v38 = vadd.f32 %v1450_v62, %v2862_v54 }
 0x419   : > { %1482 = vst [vmem:[%s3093_s21 + $0x70] sm:$0xff] %v1466_v38 }
 0x41c   : > { %v1431_v48 = vpop.f32.mrf.mxu0 }
 0x41d   : > { %v1451_v46 = vmul.f32 %v3086_v18, %v1431_v48 }
 0x41f   : > { %v1467_v49 = vadd.f32 %v1451_v46, %v2865_v55 }
 0x421   : > { %1483 = vst [vmem:[%s3093_s21 + $0x78] sm:$0xff] %v1467_v49 }
 0x422   : > { %2464 = shalt.err (!%p2461_p8)
}
 0x423   : > { %2100 = dma.vmem_to_hbm [thread:$0]  (%p2704_p5), %s1524_s28, 2048, %s1526_s29, %s1490_s11, %s2544_s2, %s2544_s2, %s2545_s13  }
 0x424 PF: > { %s3262_s4 = sld [smem:[#allocation23_spill]]  ;;  %p2121_p10 = pnand %p1706_p11, %p2649_p6 }
 0x425   : > { %s3264_s10 = sld [smem:[#allocation25_spill]] }
 0x426   : > { %p2122_p12 = pneg %p2121_p10 }
 0x42a   : > { %s1540_s8 = sand.u32 1, %s3262_s4  }
 0x42b   : > { %s1541_s27 = scalar_lea.sflag [#allocation7], %s1540_s8 }
 0x42c   : > { %2506 = dma.done.wait (%p2122_p12), %s1541_s27, 2048  }
 0x42d   : > { %2508 = vsyncadd (%p2122_p12), %s1541_s27, 4294965248  ;;  %s1551_s20 = scalar_lea.sflag [#allocation16], %s1540_s8 }
 0x42e   : > { %2510 = dma.done.wait (%p2122_p12), %s1551_s20, 2048  }
 0x42f   : > { %2512 = vsyncadd (%p2122_p12), %s1551_s20, 4294965248  ;;  %s35_s8 = sadd.s32 1, %s3264_s10   ;;  %s3265_s30 = sld [smem:[#allocation24_spill]] }
 0x430   : > { %p32_p13 = scmp.ge.s32.totalorder %s35_s8, 4   ;;  %s3266_s17 = sld [smem:[#allocation28_spill]] }
 0x431   : > { %s3267_s22 = sld [smem:[#allocation27_spill]]  ;;  %s3268_s15 = smov %s2519_s16 }
 0x432   : > { %s3270_s18 = smov %s2531_s19 }
 0x433   :  { %34 = sbr.rel (!%p32_p13) target bundleno = 18 (0x12), region = 147 }
 0x435   : > { %s3269_s16 = smov %s3265_s30 }
 0x437   : > { %s3271_s19 = smov %s3267_s22 }
 0x438   :  { %1557 = vsyncpa [#allocation6], 1 }
 0x439   :  { %1559 = vsyncpa [#allocation6 + $0x1], 1 }
 0x43a   :  { %1560 = vsyncpa [#allocation9], 1 }
 0x43b   :  { %1562 = vsyncpa [#allocation9 + $0x1], 1 }
 0x43c   :  { %1563 = vsyncpa [#allocation12], 1 }
 0x43d   :  { %1564 = vsyncpa [#allocation7], 1 }
 0x43e   :  { %1566 = vsyncpa [#allocation7 + $0x1], 1 }
 0x43f   :  { %1567 = vsyncpa [#allocation16], 1 }
 0x440   :  { %1569 = vsyncpa [#allocation16 + $0x1], 1 }

</bundles_post_ra>
